<compile_context>
chip_gen: v5e
topology: v5e:2x2
jax: 0.10.0
libtpu: 0.0.40
codegen_flags: <defaults>
</compile_context>

<pallas_src>
import numpy as np

import jax
import jax.numpy as jnp
from jax import lax
from jax.experimental import pallas as pl
from jax.experimental.pallas import tpu as pltpu


# ----------------------------- fused Pallas kernel -----------------------------

def _cnn_fashion_kernel(x_ref, t1_ref, bv1_ref, t2_ref, bv2_ref,
                        s12_ref, p1sel_ref, s4_ref, p2sel_ref,
                        fw1_ref, fb1_ref, fw2_ref, fb2_ref, fw3_ref, fb3_ref,
                        o_ref):
    f32 = jnp.float32
    x = x_ref[0, 0]                                                # [28, 28]

    # conv1 (5x5, 1->6): banded matmuls over W; output channels along lanes.
    acc1 = jnp.dot(x[0:24, :], t1_ref[0], preferred_element_type=f32)
    for kh in range(1, 5):
        acc1 = acc1 + jnp.dot(x[kh:kh + 24, :], t1_ref[kh],
                              preferred_element_type=f32)          # [24, 144]
    y1 = jnp.maximum(acc1 + bv1_ref[...], 0.0)

    # 2x2 max-pool, stride 2: shifted max + 0/1 selection matmuls.
    mh = jnp.maximum(y1[0:23, :], y1[1:24, :])                     # [23, 144]
    zh = jnp.dot(s12_ref[...], mh, preferred_element_type=f32)     # [12, 144]
    mw = jnp.maximum(zh[:, 0:143], zh[:, 1:144])                   # [12, 143]
    p1 = jnp.dot(mw, p1sel_ref[...], preferred_element_type=f32)   # [12, 72]

    # conv2 (5x5, 6->12); nn.Dropout2d is identity at inference time.
    acc2 = jnp.dot(p1[0:8, :], t2_ref[0], preferred_element_type=f32)
    for kh in range(1, 5):
        acc2 = acc2 + jnp.dot(p1[kh:kh + 8, :], t2_ref[kh],
                              preferred_element_type=f32)          # [8, 96]
    y2 = jnp.maximum(acc2 + bv2_ref[...], 0.0)

    mh2 = jnp.maximum(y2[0:7, :], y2[1:8, :])                      # [7, 96]
    z2 = jnp.dot(s4_ref[...], mh2, preferred_element_type=f32)     # [4, 96]
    mw2 = jnp.maximum(z2[:, 0:95], z2[:, 1:96])                    # [4, 95]
    p2 = jnp.dot(mw2, p2sel_ref[...], preferred_element_type=f32)  # [4, 48]

    # fc1 (192->84, padded to 128 lanes).  The PyTorch NCHW flatten is folded
    # into the row-gathered weight fw1_ref[h]; nn.Dropout is identity at eval.
    h1 = fb1_ref[...]                                              # [1, 128]
    for h in range(4):
        h1 = h1 + jnp.dot(p2[h:h + 1, :], fw1_ref[h],
                          preferred_element_type=f32)
    h1 = jnp.maximum(h1, 0.0)

    # fc2 (84->42, padded) + ReLU
    h2 = jnp.maximum(
        jnp.dot(h1, fw2_ref[...], preferred_element_type=f32) + fb2_ref[...],
        0.0)                                                       # [1, 128]

    # fc3 (42->num_classes, padded; pad lanes carry a -1e9 bias) + softmax.
    logits = (jnp.dot(h2, fw3_ref[...], preferred_element_type=f32)
              + fb3_ref[...])                                      # [1, 128]
    m = jnp.max(logits, axis=-1, keepdims=True)
    e = jnp.exp(logits - m)                                        # pads -> 0
    denom = jnp.sum(e, axis=-1, keepdims=True)
    o_ref[0] = e * pl.reciprocal(denom, approx=True)


def cnn_fashion_forward(x_nchw, kp, num_classes):
    B = x_nchw.shape[0]

    def _full(shape):
        return pl.BlockSpec(shape, lambda b: (0,) * len(shape))

    out_pad = pl.pallas_call(
        _cnn_fashion_kernel,
        out_shape=jax.ShapeDtypeStruct((B, 1, 128), jnp.float32),
        grid=(B,),
        in_specs=[
            pl.BlockSpec((1, 1, 28, 28), lambda b: (b, 0, 0, 0)),  # image b
            _full((5, 28, 144)),   # t1   (conv1 banded weights)
            _full((1, 144)),       # bv1
            _full((5, 72, 96)),    # t2   (conv2 banded weights)
            _full((1, 96)),        # bv2
            _full((12, 23)),       # s12  (pool1 row selector)
            _full((143, 72)),      # p1sel (pool1 column selector)
            _full((4, 7)),         # s4   (pool2 row selector)
            _full((95, 48)),       # p2sel (pool2 column selector)
            _full((4, 48, 128)),   # fw1g (fc1, flatten folded in, padded)
            _full((1, 128)),       # fb1
            _full((128, 128)),     # fw2 (padded)
            _full((1, 128)),       # fb2
            _full((128, 128)),     # fw3 (padded)
            _full((1, 128)),       # fb3 (pads = -1e9)
        ],
        out_specs=pl.BlockSpec((1, 1, 128), lambda b: (b, 0, 0)),
        compiler_params=pltpu.CompilerParams(
            dimension_semantics=("parallel",)),
    )(x_nchw, kp["t1"], kp["bv1"], kp["t2"], kp["bv2"],
      kp["s12"], kp["p1sel"], kp["s4"], kp["p2sel"],
      kp["fw1g"], kp["fb1"], kp["fw2"], kp["fb2"], kp["fw3"], kp["fb3"])
    return out_pad[:, 0, :num_classes]


# ------------------------------ parameters & prep ------------------------------

def init_params(key, num_classes):
    """Random parameters in PyTorch layouts (conv: OIHW; linear stored [in, out])."""
    ks = jax.random.split(key, 10)

    def u(k, shape, fan_in):
        bound = 1.0 / float(fan_in) ** 0.5
        return jax.random.uniform(k, shape, jnp.float32, -bound, bound)

    return {
        "conv1_w": u(ks[0], (6, 1, 5, 5), 25), "conv1_b": u(ks[1], (6,), 25),
        "conv2_w": u(ks[2], (12, 6, 5, 5), 150), "conv2_b": u(ks[3], (12,), 150),
        # NOTE: real PyTorch Linear weights are [out, in] -> transpose when loading.
        "fc1_w": u(ks[4], (192, 84), 192), "fc1_b": u(ks[5], (84,), 192),
        "fc2_w": u(ks[6], (84, 42), 84), "fc2_b": u(ks[7], (42,), 84),
        "fc3_w": u(ks[8], (42, num_classes), 42), "fc3_b": u(ks[9], (num_classes,), 42),
    }


def prepare_kernel_params(params, num_classes):
    """One-time host-side repacking of the weights into the fused-kernel layouts."""
    W1 = np.asarray(params["conv1_w"], np.float32)   # [6,1,5,5]  (OIHW)
    b1 = np.asarray(params["conv1_b"], np.float32)
    W2 = np.asarray(params["conv2_w"], np.float32)   # [12,6,5,5]
    b2 = np.asarray(params["conv2_b"], np.float32)
    fw1 = np.asarray(params["fc1_w"], np.float32)    # [192, 84]  ([in, out])
    fb1 = np.asarray(params["fc1_b"], np.float32)
    fw2 = np.asarray(params["fc2_w"], np.float32)    # [84, 42]
    fb2 = np.asarray(params["fc2_b"], np.float32)
    fw3 = np.asarray(params["fc3_w"], np.float32)    # [42, NC]
    fb3 = np.asarray(params["fc3_b"], np.float32)

    # conv1 as banded matmuls: T1[kh][w_in, co*24 + ow] = W1[co, 0, kh, w_in - ow]
    T1 = np.zeros((5, 28, 6 * 24), np.float32)
    for kh in range(5):
        for co in range(6):
            for kw in range(5):
                for ow in range(24):
                    T1[kh, ow + kw, co * 24 + ow] = W1[co, 0, kh, kw]
    bv1 = np.repeat(b1, 24)[None, :]                               # [1, 144]

    # conv2: pooled input columns are ci*12 + w; T2[kh][ci*12 + w_in, co*8 + ow]
    T2 = np.zeros((5, 6 * 12, 12 * 8), np.float32)
    for kh in range(5):
        for co in range(12):
            for ci in range(6):
                for kw in range(5):
                    for ow in range(8):
                        T2[kh, ci * 12 + ow + kw, co * 8 + ow] = W2[co, ci, kh, kw]
    bv2 = np.repeat(b2, 8)[None, :]                                # [1, 96]

    # 0/1 selectors implementing the stride-2 part of the 2x2 max pools.
    S12 = np.zeros((12, 23), np.float32)
    S12[np.arange(12), 2 * np.arange(12)] = 1.0
    P1 = np.zeros((143, 72), np.float32)
    for co in range(6):
        for j in range(12):
            P1[co * 24 + 2 * j, co * 12 + j] = 1.0
    S4 = np.zeros((4, 7), np.float32)
    S4[np.arange(4), 2 * np.arange(4)] = 1.0
    P2 = np.zeros((95, 48), np.float32)
    for co in range(12):
        for j in range(4):
            P2[co * 8 + 2 * j, co * 4 + j] = 1.0

    # fc1: fold the PyTorch NCHW flatten (feature = co*16 + h*4 + w) into a row
    # gather so the kernel can consume the pooled [h, co*4 + w] layout directly;
    # pad the 84 output lanes to 128.
    fw1g = np.zeros((4, 48, 128), np.float32)
    for h in range(4):
        for co in range(12):
            for w in range(4):
                fw1g[h, co * 4 + w, :84] = fw1[co * 16 + h * 4 + w, :]
    fb1p = np.zeros((1, 128), np.float32)
    fb1p[0, :84] = fb1
    fw2p = np.zeros((128, 128), np.float32)
    fw2p[:84, :42] = fw2
    fb2p = np.zeros((1, 128), np.float32)
    fb2p[0, :42] = fb2
    fw3p = np.zeros((128, 128), np.float32)
    fw3p[:42, :num_classes] = fw3
    fb3p = np.full((1, 128), -1e9, np.float32)   # pad lanes excluded from softmax
    fb3p[0, :num_classes] = fb3

    host = {"t1": T1, "bv1": bv1, "t2": T2, "bv2": bv2,
            "s12": S12, "p1sel": P1, "s4": S4, "p2sel": P2,
            "fw1g": fw1g, "fb1": fb1p, "fw2": fw2p, "fb2": fb2p,
            "fw3": fw3p, "fb3": fb3p}
    return {k: jnp.asarray(v) for k, v in host.items()}


# ------------------------------ plain-JAX reference ----------------------------

def _maxpool2x2_ref(x):  # NCHW, even H and W
    B, C, H, W = x.shape
    return x.reshape(B, C, H // 2, 2, W // 2, 2).max(axis=(3, 5))


def cnn_fashion_reference(x_nchw, params):
    hp = lax.Precision.HIGHEST
    y = lax.conv_general_dilated(x_nchw, params["conv1_w"], (1, 1), "VALID",
                                 dimension_numbers=("NCHW", "OIHW", "NCHW"),
                                 precision=hp)
    y = _maxpool2x2_ref(jnp.maximum(y + params["conv1_b"][None, :, None, None], 0.0))
    y = lax.conv_general_dilated(y, params["conv2_w"], (1, 1), "VALID",
                                 dimension_numbers=("NCHW", "OIHW", "NCHW"),
                                 precision=hp)
    y = _maxpool2x2_ref(jnp.maximum(y + params["conv2_b"][None, :, None, None], 0.0))
    feat = y.reshape(y.shape[0], -1)                 # NCHW flatten == torch .view
    h1 = jnp.maximum(jnp.dot(feat, params["fc1_w"], precision=hp) + params["fc1_b"], 0.0)
    h2 = jnp.maximum(jnp.dot(h1, params["fc2_w"], precision=hp) + params["fc2_b"], 0.0)
    logits = jnp.dot(h2, params["fc3_w"], precision=hp) + params["fc3_b"]
    return jax.nn.softmax(logits, axis=-1)


if __name__ == "__main__":
    num_classes = 10           # args.num_classes
    key = jax.random.PRNGKey(0)
    kx, kparam = jax.random.split(key)

    # fc1 expects 12*4*4 features, which pins the input to 1x28x28.
    x = jax.random.normal(kx, (2, 1, 28, 28), jnp.float32)
    params = init_params(kparam, num_classes)
    kp = prepare_kernel_params(params, num_classes)

    fwd = jax.jit(cnn_fashion_forward, static_argnums=2)
    out = jax.block_until_ready(fwd(x, kp, num_classes))

    assert out.shape == (2, num_classes)
    assert bool(jnp.all(jnp.isfinite(out)))
    # softmax rows sum to 1 (approx reciprocal -> loose tolerance)
    assert bool(jnp.allclose(jnp.sum(out, axis=-1), 1.0, atol=1e-2))

    # parity vs. a plain-XLA reference of the PyTorch forward
    ref = cnn_fashion_reference(x, params)
    err = float(jnp.max(jnp.abs(out - ref)))
    assert err < 2e-2, f"Pallas kernel mismatch vs XLA reference: {err}"
    print("KERNEL_OK")
</pallas_src>

<mosaic_0001>
module attributes {stable_mosaic.version = 11 : i64} {
  func.func @_cnn_fashion_kernel(%arg0: i32, %arg1: memref<1x1x28x28xf32, #tpu.memory_space<vmem>>, %arg2: memref<5x28x144xf32, #tpu.memory_space<vmem>>, %arg3: memref<1x144xf32, #tpu.memory_space<vmem>>, %arg4: memref<5x72x96xf32, #tpu.memory_space<vmem>>, %arg5: memref<1x96xf32, #tpu.memory_space<vmem>>, %arg6: memref<12x23xf32, #tpu.memory_space<vmem>>, %arg7: memref<143x72xf32, #tpu.memory_space<vmem>>, %arg8: memref<4x7xf32, #tpu.memory_space<vmem>>, %arg9: memref<95x48xf32, #tpu.memory_space<vmem>>, %arg10: memref<4x48x128xf32, #tpu.memory_space<vmem>>, %arg11: memref<1x128xf32, #tpu.memory_space<vmem>>, %arg12: memref<128x128xf32, #tpu.memory_space<vmem>>, %arg13: memref<1x128xf32, #tpu.memory_space<vmem>>, %arg14: memref<128x128xf32, #tpu.memory_space<vmem>>, %arg15: memref<1x128xf32, #tpu.memory_space<vmem>>, %arg16: memref<1x1x128xf32, #tpu.memory_space<vmem>>) attributes {dimension_semantics = [#tpu.dimension_semantics<parallel>], iteration_bounds = array<i64: 2>, scalar_prefetch = 0 : i64, scratch_operands = 0 : i64, tpu.core_type = #tpu.core_type<tc>, window_params = [{transform_indices = @transform_0, window_bounds = array<i64: 1, 1, 28, 28>}, {pipeline_mode = #tpu.pipeline_mode<synchronous>, transform_indices = @transform_1, window_bounds = array<i64: 5, 28, 144>}, {pipeline_mode = #tpu.pipeline_mode<synchronous>, transform_indices = @transform_2, window_bounds = array<i64: 1, 144>}, {pipeline_mode = #tpu.pipeline_mode<synchronous>, transform_indices = @transform_3, window_bounds = array<i64: 5, 72, 96>}, {pipeline_mode = #tpu.pipeline_mode<synchronous>, transform_indices = @transform_4, window_bounds = array<i64: 1, 96>}, {pipeline_mode = #tpu.pipeline_mode<synchronous>, transform_indices = @transform_5, window_bounds = array<i64: 12, 23>}, {pipeline_mode = #tpu.pipeline_mode<synchronous>, transform_indices = @transform_6, window_bounds = array<i64: 143, 72>}, {pipeline_mode = #tpu.pipeline_mode<synchronous>, transform_indices = @transform_7, window_bounds = array<i64: 4, 7>}, {pipeline_mode = #tpu.pipeline_mode<synchronous>, transform_indices = @transform_8, window_bounds = array<i64: 95, 48>}, {pipeline_mode = #tpu.pipeline_mode<synchronous>, transform_indices = @transform_9, window_bounds = array<i64: 4, 48, 128>}, {pipeline_mode = #tpu.pipeline_mode<synchronous>, transform_indices = @transform_10, window_bounds = array<i64: 1, 128>}, {pipeline_mode = #tpu.pipeline_mode<synchronous>, transform_indices = @transform_11, window_bounds = array<i64: 128, 128>}, {pipeline_mode = #tpu.pipeline_mode<synchronous>, transform_indices = @transform_12, window_bounds = array<i64: 1, 128>}, {pipeline_mode = #tpu.pipeline_mode<synchronous>, transform_indices = @transform_13, window_bounds = array<i64: 128, 128>}, {pipeline_mode = #tpu.pipeline_mode<synchronous>, transform_indices = @transform_14, window_bounds = array<i64: 1, 128>}, {transform_indices = @transform_15, window_bounds = array<i64: 1, 1, 128>}]} {
    %c0 = arith.constant 0 : index
    %c0_0 = arith.constant 0 : index
    %c0_1 = arith.constant 0 : index
    %c0_2 = arith.constant 0 : index
    %0 = vector.load %arg1[%c0, %c0_0, %c0_1, %c0_2] : memref<1x1x28x28xf32, #tpu.memory_space<vmem>>, vector<1x1x28x28xf32>
    %1 = vector.shape_cast %0 : vector<1x1x28x28xf32> to vector<28x28xf32>
    %2 = vector.extract_strided_slice %1 {offsets = [0, 0], sizes = [24, 28], strides = [1, 1]} : vector<28x28xf32> to vector<24x28xf32>
    %c0_3 = arith.constant 0 : index
    %c0_4 = arith.constant 0 : index
    %c0_5 = arith.constant 0 : index
    %3 = vector.load %arg2[%c0_3, %c0_4, %c0_5] : memref<5x28x144xf32, #tpu.memory_space<vmem>>, vector<1x28x144xf32>
    %4 = vector.shape_cast %3 : vector<1x28x144xf32> to vector<28x144xf32>
    %cst = arith.constant dense<0.000000e+00> : vector<24x144xf32>
    %5 = tpu.matmul %2, %4, %cst {dimension_numbers = #tpu.dot_dimension_numbers<[1], [0], [0], [1], [0, 0, 1, 1], [], []>} : vector<24x28xf32>, vector<28x144xf32>, vector<24x144xf32> -> vector<24x144xf32>
    %6 = vector.extract_strided_slice %1 {offsets = [1, 0], sizes = [24, 28], strides = [1, 1]} : vector<28x28xf32> to vector<24x28xf32>
    %c1 = arith.constant 1 : index
    %c0_6 = arith.constant 0 : index
    %c0_7 = arith.constant 0 : index
    %7 = vector.load %arg2[%c1, %c0_6, %c0_7] : memref<5x28x144xf32, #tpu.memory_space<vmem>>, vector<1x28x144xf32>
    %8 = vector.shape_cast %7 : vector<1x28x144xf32> to vector<28x144xf32>
    %cst_8 = arith.constant dense<0.000000e+00> : vector<24x144xf32>
    %9 = tpu.matmul %6, %8, %cst_8 {dimension_numbers = #tpu.dot_dimension_numbers<[1], [0], [0], [1], [0, 0, 1, 1], [], []>} : vector<24x28xf32>, vector<28x144xf32>, vector<24x144xf32> -> vector<24x144xf32>
    %10 = arith.addf %5, %9 : vector<24x144xf32>
    %11 = vector.extract_strided_slice %1 {offsets = [2, 0], sizes = [24, 28], strides = [1, 1]} : vector<28x28xf32> to vector<24x28xf32>
    %c2 = arith.constant 2 : index
    %c0_9 = arith.constant 0 : index
    %c0_10 = arith.constant 0 : index
    %12 = vector.load %arg2[%c2, %c0_9, %c0_10] : memref<5x28x144xf32, #tpu.memory_space<vmem>>, vector<1x28x144xf32>
    %13 = vector.shape_cast %12 : vector<1x28x144xf32> to vector<28x144xf32>
    %cst_11 = arith.constant dense<0.000000e+00> : vector<24x144xf32>
    %14 = tpu.matmul %11, %13, %cst_11 {dimension_numbers = #tpu.dot_dimension_numbers<[1], [0], [0], [1], [0, 0, 1, 1], [], []>} : vector<24x28xf32>, vector<28x144xf32>, vector<24x144xf32> -> vector<24x144xf32>
    %15 = arith.addf %10, %14 : vector<24x144xf32>
    %16 = vector.extract_strided_slice %1 {offsets = [3, 0], sizes = [24, 28], strides = [1, 1]} : vector<28x28xf32> to vector<24x28xf32>
    %c3 = arith.constant 3 : index
    %c0_12 = arith.constant 0 : index
    %c0_13 = arith.constant 0 : index
    %17 = vector.load %arg2[%c3, %c0_12, %c0_13] : memref<5x28x144xf32, #tpu.memory_space<vmem>>, vector<1x28x144xf32>
    %18 = vector.shape_cast %17 : vector<1x28x144xf32> to vector<28x144xf32>
    %cst_14 = arith.constant dense<0.000000e+00> : vector<24x144xf32>
    %19 = tpu.matmul %16, %18, %cst_14 {dimension_numbers = #tpu.dot_dimension_numbers<[1], [0], [0], [1], [0, 0, 1, 1], [], []>} : vector<24x28xf32>, vector<28x144xf32>, vector<24x144xf32> -> vector<24x144xf32>
    %20 = arith.addf %15, %19 : vector<24x144xf32>
    %21 = vector.extract_strided_slice %1 {offsets = [4, 0], sizes = [24, 28], strides = [1, 1]} : vector<28x28xf32> to vector<24x28xf32>
    %c4 = arith.constant 4 : index
    %c0_15 = arith.constant 0 : index
    %c0_16 = arith.constant 0 : index
    %22 = vector.load %arg2[%c4, %c0_15, %c0_16] : memref<5x28x144xf32, #tpu.memory_space<vmem>>, vector<1x28x144xf32>
    %23 = vector.shape_cast %22 : vector<1x28x144xf32> to vector<28x144xf32>
    %cst_17 = arith.constant dense<0.000000e+00> : vector<24x144xf32>
    %24 = tpu.matmul %21, %23, %cst_17 {dimension_numbers = #tpu.dot_dimension_numbers<[1], [0], [0], [1], [0, 0, 1, 1], [], []>} : vector<24x28xf32>, vector<28x144xf32>, vector<24x144xf32> -> vector<24x144xf32>
    %25 = arith.addf %20, %24 : vector<24x144xf32>
    %c0_18 = arith.constant 0 : index
    %c0_19 = arith.constant 0 : index
    %26 = vector.load %arg3[%c0_18, %c0_19] : memref<1x144xf32, #tpu.memory_space<vmem>>, vector<1x144xf32>
    %27 = vector.broadcast %26 : vector<1x144xf32> to vector<24x144xf32>
    %28 = arith.addf %25, %27 : vector<24x144xf32>
    %cst_20 = arith.constant 0.000000e+00 : f32
    %29 = vector.broadcast %cst_20 : f32 to vector<24x144xf32>
    %30 = arith.maximumf %28, %29 : vector<24x144xf32>
    %31 = vector.extract_strided_slice %30 {offsets = [0, 0], sizes = [23, 144], strides = [1, 1]} : vector<24x144xf32> to vector<23x144xf32>
    %32 = vector.extract_strided_slice %30 {offsets = [1, 0], sizes = [23, 144], strides = [1, 1]} : vector<24x144xf32> to vector<23x144xf32>
    %33 = arith.maximumf %31, %32 : vector<23x144xf32>
    %c0_21 = arith.constant 0 : index
    %c0_22 = arith.constant 0 : index
    %34 = vector.load %arg6[%c0_21, %c0_22] : memref<12x23xf32, #tpu.memory_space<vmem>>, vector<12x23xf32>
    %cst_23 = arith.constant dense<0.000000e+00> : vector<12x144xf32>
    %35 = tpu.matmul %34, %33, %cst_23 {dimension_numbers = #tpu.dot_dimension_numbers<[1], [0], [0], [1], [0, 0, 1, 1], [], []>} : vector<12x23xf32>, vector<23x144xf32>, vector<12x144xf32> -> vector<12x144xf32>
    %36 = vector.extract_strided_slice %35 {offsets = [0, 0], sizes = [12, 143], strides = [1, 1]} : vector<12x144xf32> to vector<12x143xf32>
    %37 = vector.extract_strided_slice %35 {offsets = [0, 1], sizes = [12, 143], strides = [1, 1]} : vector<12x144xf32> to vector<12x143xf32>
    %38 = arith.maximumf %36, %37 : vector<12x143xf32>
    %c0_24 = arith.constant 0 : index
    %c0_25 = arith.constant 0 : index
    %39 = vector.load %arg7[%c0_24, %c0_25] : memref<143x72xf32, #tpu.memory_space<vmem>>, vector<143x72xf32>
    %cst_26 = arith.constant dense<0.000000e+00> : vector<12x72xf32>
    %40 = tpu.matmul %38, %39, %cst_26 {dimension_numbers = #tpu.dot_dimension_numbers<[1], [0], [0], [1], [0, 0, 1, 1], [], []>} : vector<12x143xf32>, vector<143x72xf32>, vector<12x72xf32> -> vector<12x72xf32>
    %41 = vector.extract_strided_slice %40 {offsets = [0, 0], sizes = [8, 72], strides = [1, 1]} : vector<12x72xf32> to vector<8x72xf32>
    %c0_27 = arith.constant 0 : index
    %c0_28 = arith.constant 0 : index
    %c0_29 = arith.constant 0 : index
    %42 = vector.load %arg4[%c0_27, %c0_28, %c0_29] : memref<5x72x96xf32, #tpu.memory_space<vmem>>, vector<1x72x96xf32>
    %43 = vector.shape_cast %42 : vector<1x72x96xf32> to vector<72x96xf32>
    %cst_30 = arith.constant dense<0.000000e+00> : vector<8x96xf32>
    %44 = tpu.matmul %41, %43, %cst_30 {dimension_numbers = #tpu.dot_dimension_numbers<[1], [0], [0], [1], [0, 0, 1, 1], [], []>} : vector<8x72xf32>, vector<72x96xf32>, vector<8x96xf32> -> vector<8x96xf32>
    %45 = vector.extract_strided_slice %40 {offsets = [1, 0], sizes = [8, 72], strides = [1, 1]} : vector<12x72xf32> to vector<8x72xf32>
    %c1_31 = arith.constant 1 : index
    %c0_32 = arith.constant 0 : index
    %c0_33 = arith.constant 0 : index
    %46 = vector.load %arg4[%c1_31, %c0_32, %c0_33] : memref<5x72x96xf32, #tpu.memory_space<vmem>>, vector<1x72x96xf32>
    %47 = vector.shape_cast %46 : vector<1x72x96xf32> to vector<72x96xf32>
    %cst_34 = arith.constant dense<0.000000e+00> : vector<8x96xf32>
    %48 = tpu.matmul %45, %47, %cst_34 {dimension_numbers = #tpu.dot_dimension_numbers<[1], [0], [0], [1], [0, 0, 1, 1], [], []>} : vector<8x72xf32>, vector<72x96xf32>, vector<8x96xf32> -> vector<8x96xf32>
    %49 = arith.addf %44, %48 : vector<8x96xf32>
    %50 = vector.extract_strided_slice %40 {offsets = [2, 0], sizes = [8, 72], strides = [1, 1]} : vector<12x72xf32> to vector<8x72xf32>
    %c2_35 = arith.constant 2 : index
    %c0_36 = arith.constant 0 : index
    %c0_37 = arith.constant 0 : index
    %51 = vector.load %arg4[%c2_35, %c0_36, %c0_37] : memref<5x72x96xf32, #tpu.memory_space<vmem>>, vector<1x72x96xf32>
    %52 = vector.shape_cast %51 : vector<1x72x96xf32> to vector<72x96xf32>
    %cst_38 = arith.constant dense<0.000000e+00> : vector<8x96xf32>
    %53 = tpu.matmul %50, %52, %cst_38 {dimension_numbers = #tpu.dot_dimension_numbers<[1], [0], [0], [1], [0, 0, 1, 1], [], []>} : vector<8x72xf32>, vector<72x96xf32>, vector<8x96xf32> -> vector<8x96xf32>
    %54 = arith.addf %49, %53 : vector<8x96xf32>
    %55 = vector.extract_strided_slice %40 {offsets = [3, 0], sizes = [8, 72], strides = [1, 1]} : vector<12x72xf32> to vector<8x72xf32>
    %c3_39 = arith.constant 3 : index
    %c0_40 = arith.constant 0 : index
    %c0_41 = arith.constant 0 : index
    %56 = vector.load %arg4[%c3_39, %c0_40, %c0_41] : memref<5x72x96xf32, #tpu.memory_space<vmem>>, vector<1x72x96xf32>
    %57 = vector.shape_cast %56 : vector<1x72x96xf32> to vector<72x96xf32>
    %cst_42 = arith.constant dense<0.000000e+00> : vector<8x96xf32>
    %58 = tpu.matmul %55, %57, %cst_42 {dimension_numbers = #tpu.dot_dimension_numbers<[1], [0], [0], [1], [0, 0, 1, 1], [], []>} : vector<8x72xf32>, vector<72x96xf32>, vector<8x96xf32> -> vector<8x96xf32>
    %59 = arith.addf %54, %58 : vector<8x96xf32>
    %60 = vector.extract_strided_slice %40 {offsets = [4, 0], sizes = [8, 72], strides = [1, 1]} : vector<12x72xf32> to vector<8x72xf32>
    %c4_43 = arith.constant 4 : index
    %c0_44 = arith.constant 0 : index
    %c0_45 = arith.constant 0 : index
    %61 = vector.load %arg4[%c4_43, %c0_44, %c0_45] : memref<5x72x96xf32, #tpu.memory_space<vmem>>, vector<1x72x96xf32>
    %62 = vector.shape_cast %61 : vector<1x72x96xf32> to vector<72x96xf32>
    %cst_46 = arith.constant dense<0.000000e+00> : vector<8x96xf32>
    %63 = tpu.matmul %60, %62, %cst_46 {dimension_numbers = #tpu.dot_dimension_numbers<[1], [0], [0], [1], [0, 0, 1, 1], [], []>} : vector<8x72xf32>, vector<72x96xf32>, vector<8x96xf32> -> vector<8x96xf32>
    %64 = arith.addf %59, %63 : vector<8x96xf32>
    %c0_47 = arith.constant 0 : index
    %c0_48 = arith.constant 0 : index
    %65 = vector.load %arg5[%c0_47, %c0_48] : memref<1x96xf32, #tpu.memory_space<vmem>>, vector<1x96xf32>
    %66 = vector.broadcast %65 : vector<1x96xf32> to vector<8x96xf32>
    %67 = arith.addf %64, %66 : vector<8x96xf32>
    %cst_49 = arith.constant 0.000000e+00 : f32
    %68 = vector.broadcast %cst_49 : f32 to vector<8x96xf32>
    %69 = arith.maximumf %67, %68 : vector<8x96xf32>
    %70 = vector.extract_strided_slice %69 {offsets = [0, 0], sizes = [7, 96], strides = [1, 1]} : vector<8x96xf32> to vector<7x96xf32>
    %71 = vector.extract_strided_slice %69 {offsets = [1, 0], sizes = [7, 96], strides = [1, 1]} : vector<8x96xf32> to vector<7x96xf32>
    %72 = arith.maximumf %70, %71 : vector<7x96xf32>
    %c0_50 = arith.constant 0 : index
    %c0_51 = arith.constant 0 : index
    %73 = vector.load %arg8[%c0_50, %c0_51] : memref<4x7xf32, #tpu.memory_space<vmem>>, vector<4x7xf32>
    %cst_52 = arith.constant dense<0.000000e+00> : vector<4x96xf32>
    %74 = tpu.matmul %73, %72, %cst_52 {dimension_numbers = #tpu.dot_dimension_numbers<[1], [0], [0], [1], [0, 0, 1, 1], [], []>} : vector<4x7xf32>, vector<7x96xf32>, vector<4x96xf32> -> vector<4x96xf32>
    %75 = vector.extract_strided_slice %74 {offsets = [0, 0], sizes = [4, 95], strides = [1, 1]} : vector<4x96xf32> to vector<4x95xf32>
    %76 = vector.extract_strided_slice %74 {offsets = [0, 1], sizes = [4, 95], strides = [1, 1]} : vector<4x96xf32> to vector<4x95xf32>
    %77 = arith.maximumf %75, %76 : vector<4x95xf32>
    %c0_53 = arith.constant 0 : index
    %c0_54 = arith.constant 0 : index
    %78 = vector.load %arg9[%c0_53, %c0_54] : memref<95x48xf32, #tpu.memory_space<vmem>>, vector<95x48xf32>
    %cst_55 = arith.constant dense<0.000000e+00> : vector<4x48xf32>
    %79 = tpu.matmul %77, %78, %cst_55 {dimension_numbers = #tpu.dot_dimension_numbers<[1], [0], [0], [1], [0, 0, 1, 1], [], []>} : vector<4x95xf32>, vector<95x48xf32>, vector<4x48xf32> -> vector<4x48xf32>
    %c0_56 = arith.constant 0 : index
    %c0_57 = arith.constant 0 : index
    %80 = vector.load %arg11[%c0_56, %c0_57] : memref<1x128xf32, #tpu.memory_space<vmem>>, vector<1x128xf32>
    %81 = vector.extract_strided_slice %79 {offsets = [0, 0], sizes = [1, 48], strides = [1, 1]} : vector<4x48xf32> to vector<1x48xf32>
    %c0_58 = arith.constant 0 : index
    %c0_59 = arith.constant 0 : index
    %c0_60 = arith.constant 0 : index
    %82 = vector.load %arg10[%c0_58, %c0_59, %c0_60] : memref<4x48x128xf32, #tpu.memory_space<vmem>>, vector<1x48x128xf32>
    %83 = vector.shape_cast %82 : vector<1x48x128xf32> to vector<48x128xf32>
    %cst_61 = arith.constant dense<0.000000e+00> : vector<1x128xf32>
    %84 = tpu.matmul %81, %83, %cst_61 {dimension_numbers = #tpu.dot_dimension_numbers<[1], [0], [0], [1], [0, 0, 1, 1], [], []>} : vector<1x48xf32>, vector<48x128xf32>, vector<1x128xf32> -> vector<1x128xf32>
    %85 = arith.addf %80, %84 : vector<1x128xf32>
    %86 = vector.extract_strided_slice %79 {offsets = [1, 0], sizes = [1, 48], strides = [1, 1]} : vector<4x48xf32> to vector<1x48xf32>
    %c1_62 = arith.constant 1 : index
    %c0_63 = arith.constant 0 : index
    %c0_64 = arith.constant 0 : index
    %87 = vector.load %arg10[%c1_62, %c0_63, %c0_64] : memref<4x48x128xf32, #tpu.memory_space<vmem>>, vector<1x48x128xf32>
    %88 = vector.shape_cast %87 : vector<1x48x128xf32> to vector<48x128xf32>
    %cst_65 = arith.constant dense<0.000000e+00> : vector<1x128xf32>
    %89 = tpu.matmul %86, %88, %cst_65 {dimension_numbers = #tpu.dot_dimension_numbers<[1], [0], [0], [1], [0, 0, 1, 1], [], []>} : vector<1x48xf32>, vector<48x128xf32>, vector<1x128xf32> -> vector<1x128xf32>
    %90 = arith.addf %85, %89 : vector<1x128xf32>
    %91 = vector.extract_strided_slice %79 {offsets = [2, 0], sizes = [1, 48], strides = [1, 1]} : vector<4x48xf32> to vector<1x48xf32>
    %c2_66 = arith.constant 2 : index
    %c0_67 = arith.constant 0 : index
    %c0_68 = arith.constant 0 : index
    %92 = vector.load %arg10[%c2_66, %c0_67, %c0_68] : memref<4x48x128xf32, #tpu.memory_space<vmem>>, vector<1x48x128xf32>
    %93 = vector.shape_cast %92 : vector<1x48x128xf32> to vector<48x128xf32>
    %cst_69 = arith.constant dense<0.000000e+00> : vector<1x128xf32>
    %94 = tpu.matmul %91, %93, %cst_69 {dimension_numbers = #tpu.dot_dimension_numbers<[1], [0], [0], [1], [0, 0, 1, 1], [], []>} : vector<1x48xf32>, vector<48x128xf32>, vector<1x128xf32> -> vector<1x128xf32>
    %95 = arith.addf %90, %94 : vector<1x128xf32>
    %96 = vector.extract_strided_slice %79 {offsets = [3, 0], sizes = [1, 48], strides = [1, 1]} : vector<4x48xf32> to vector<1x48xf32>
    %c3_70 = arith.constant 3 : index
    %c0_71 = arith.constant 0 : index
    %c0_72 = arith.constant 0 : index
    %97 = vector.load %arg10[%c3_70, %c0_71, %c0_72] : memref<4x48x128xf32, #tpu.memory_space<vmem>>, vector<1x48x128xf32>
    %98 = vector.shape_cast %97 : vector<1x48x128xf32> to vector<48x128xf32>
    %cst_73 = arith.constant dense<0.000000e+00> : vector<1x128xf32>
    %99 = tpu.matmul %96, %98, %cst_73 {dimension_numbers = #tpu.dot_dimension_numbers<[1], [0], [0], [1], [0, 0, 1, 1], [], []>} : vector<1x48xf32>, vector<48x128xf32>, vector<1x128xf32> -> vector<1x128xf32>
    %100 = arith.addf %95, %99 : vector<1x128xf32>
    %cst_74 = arith.constant 0.000000e+00 : f32
    %101 = vector.broadcast %cst_74 : f32 to vector<1x128xf32>
    %102 = arith.maximumf %100, %101 : vector<1x128xf32>
    %c0_75 = arith.constant 0 : index
    %c0_76 = arith.constant 0 : index
    %103 = vector.load %arg12[%c0_75, %c0_76] : memref<128x128xf32, #tpu.memory_space<vmem>>, vector<128x128xf32>
    %cst_77 = arith.constant dense<0.000000e+00> : vector<1x128xf32>
    %104 = tpu.matmul %102, %103, %cst_77 {dimension_numbers = #tpu.dot_dimension_numbers<[1], [0], [0], [1], [0, 0, 1, 1], [], []>} : vector<1x128xf32>, vector<128x128xf32>, vector<1x128xf32> -> vector<1x128xf32>
    %c0_78 = arith.constant 0 : index
    %c0_79 = arith.constant 0 : index
    %105 = vector.load %arg13[%c0_78, %c0_79] : memref<1x128xf32, #tpu.memory_space<vmem>>, vector<1x128xf32>
    %106 = arith.addf %104, %105 : vector<1x128xf32>
    %cst_80 = arith.constant 0.000000e+00 : f32
    %107 = vector.broadcast %cst_80 : f32 to vector<1x128xf32>
    %108 = arith.maximumf %106, %107 : vector<1x128xf32>
    %c0_81 = arith.constant 0 : index
    %c0_82 = arith.constant 0 : index
    %109 = vector.load %arg14[%c0_81, %c0_82] : memref<128x128xf32, #tpu.memory_space<vmem>>, vector<128x128xf32>
    %cst_83 = arith.constant dense<0.000000e+00> : vector<1x128xf32>
    %110 = tpu.matmul %108, %109, %cst_83 {dimension_numbers = #tpu.dot_dimension_numbers<[1], [0], [0], [1], [0, 0, 1, 1], [], []>} : vector<1x128xf32>, vector<128x128xf32>, vector<1x128xf32> -> vector<1x128xf32>
    %c0_84 = arith.constant 0 : index
    %c0_85 = arith.constant 0 : index
    %111 = vector.load %arg15[%c0_84, %c0_85] : memref<1x128xf32, #tpu.memory_space<vmem>>, vector<1x128xf32>
    %112 = arith.addf %110, %111 : vector<1x128xf32>
    %cst_86 = arith.constant dense<0xFF800000> : vector<1xf32>
    %113 = vector.multi_reduction <maximumf>, %112, %cst_86 [1] : vector<1x128xf32> to vector<1xf32>
    %114 = vector.shape_cast %113 : vector<1xf32> to vector<1x1xf32>
    %115 = vector.broadcast %114 : vector<1x1xf32> to vector<1x128xf32>
    %116 = arith.subf %112, %115 : vector<1x128xf32>
    %117 = math.exp %116 : vector<1x128xf32>
    %cst_87 = arith.constant dense<0.000000e+00> : vector<1xf32>
    %118 = vector.multi_reduction <add>, %117, %cst_87 [1] : vector<1x128xf32> to vector<1xf32>
    %119 = vector.shape_cast %118 : vector<1xf32> to vector<1x1xf32>
    %120 = tpu.reciprocal %119 {approx = true} : vector<1x1xf32> -> vector<1x1xf32>
    %121 = vector.broadcast %120 : vector<1x1xf32> to vector<1x128xf32>
    %122 = arith.mulf %117, %121 : vector<1x128xf32>
    %c0_88 = arith.constant 0 : index
    %c0_89 = arith.constant 0 : index
    %c0_90 = arith.constant 0 : index
    %123 = vector.load %arg16[%c0_88, %c0_89, %c0_90] : memref<1x1x128xf32, #tpu.memory_space<vmem>>, vector<1x1x128xf32>
    %124 = vector.shape_cast %123 : vector<1x1x128xf32> to vector<1x128xf32>
    %125 = vector.shape_cast %122 : vector<1x128xf32> to vector<1x1x128xf32>
    tpu.vector_store %arg16[%c0_88, %c0_89, %c0_90], %125 {strides = array<i32>} : memref<1x1x128xf32, #tpu.memory_space<vmem>>, vector<1x1x128xf32>,
    return
  }
  func.func @transform_0(%arg0: i32) -> (i32, i32, i32, i32) {
    %c0_i32 = arith.constant 0 : i32
    %c0_i32_0 = arith.constant 0 : i32
    %c0_i32_1 = arith.constant 0 : i32
    %c0_i32_2 = arith.constant 0 : i32
    return %arg0, %c0_i32, %c0_i32_0, %c0_i32_1 : i32, i32, i32, i32
  }
  func.func @transform_1(%arg0: i32) -> (i32, i32, i32) {
    %c0_i32 = arith.constant 0 : i32
    %c0_i32_0 = arith.constant 0 : i32
    %c0_i32_1 = arith.constant 0 : i32
    %c0_i32_2 = arith.constant 0 : i32
    return %c0_i32, %c0_i32_0, %c0_i32_1 : i32, i32, i32
  }
  func.func @transform_2(%arg0: i32) -> (i32, i32) {
    %c0_i32 = arith.constant 0 : i32
    %c0_i32_0 = arith.constant 0 : i32
    %c0_i32_1 = arith.constant 0 : i32
    return %c0_i32, %c0_i32_0 : i32, i32
  }
  func.func @transform_3(%arg0: i32) -> (i32, i32, i32) {
    %c0_i32 = arith.constant 0 : i32
    %c0_i32_0 = arith.constant 0 : i32
    %c0_i32_1 = arith.constant 0 : i32
    %c0_i32_2 = arith.constant 0 : i32
    return %c0_i32, %c0_i32_0, %c0_i32_1 : i32, i32, i32
  }
  func.func @transform_4(%arg0: i32) -> (i32, i32) {
    %c0_i32 = arith.constant 0 : i32
    %c0_i32_0 = arith.constant 0 : i32
    %c0_i32_1 = arith.constant 0 : i32
    return %c0_i32, %c0_i32_0 : i32, i32
  }
  func.func @transform_5(%arg0: i32) -> (i32, i32) {
    %c0_i32 = arith.constant 0 : i32
    %c0_i32_0 = arith.constant 0 : i32
    %c0_i32_1 = arith.constant 0 : i32
    return %c0_i32, %c0_i32_0 : i32, i32
  }
  func.func @transform_6(%arg0: i32) -> (i32, i32) {
    %c0_i32 = arith.constant 0 : i32
    %c0_i32_0 = arith.constant 0 : i32
    %c0_i32_1 = arith.constant 0 : i32
    return %c0_i32, %c0_i32_0 : i32, i32
  }
  func.func @transform_7(%arg0: i32) -> (i32, i32) {
    %c0_i32 = arith.constant 0 : i32
    %c0_i32_0 = arith.constant 0 : i32
    %c0_i32_1 = arith.constant 0 : i32
    return %c0_i32, %c0_i32_0 : i32, i32
  }
  func.func @transform_8(%arg0: i32) -> (i32, i32) {
    %c0_i32 = arith.constant 0 : i32
    %c0_i32_0 = arith.constant 0 : i32
    %c0_i32_1 = arith.constant 0 : i32
    return %c0_i32, %c0_i32_0 : i32, i32
  }
  func.func @transform_9(%arg0: i32) -> (i32, i32, i32) {
    %c0_i32 = arith.constant 0 : i32
    %c0_i32_0 = arith.constant 0 : i32
    %c0_i32_1 = arith.constant 0 : i32
    %c0_i32_2 = arith.constant 0 : i32
    return %c0_i32, %c0_i32_0, %c0_i32_1 : i32, i32, i32
  }
  func.func @transform_10(%arg0: i32) -> (i32, i32) {
    %c0_i32 = arith.constant 0 : i32
    %c0_i32_0 = arith.constant 0 : i32
    %c0_i32_1 = arith.constant 0 : i32
    return %c0_i32, %c0_i32_0 : i32, i32
  }
  func.func @transform_11(%arg0: i32) -> (i32, i32) {
    %c0_i32 = arith.constant 0 : i32
    %c0_i32_0 = arith.constant 0 : i32
    %c0_i32_1 = arith.constant 0 : i32
    return %c0_i32, %c0_i32_0 : i32, i32
  }
  func.func @transform_12(%arg0: i32) -> (i32, i32) {
    %c0_i32 = arith.constant 0 : i32
    %c0_i32_0 = arith.constant 0 : i32
    %c0_i32_1 = arith.constant 0 : i32
    return %c0_i32, %c0_i32_0 : i32, i32
  }
  func.func @transform_13(%arg0: i32) -> (i32, i32) {
    %c0_i32 = arith.constant 0 : i32
    %c0_i32_0 = arith.constant 0 : i32
    %c0_i32_1 = arith.constant 0 : i32
    return %c0_i32, %c0_i32_0 : i32, i32
  }
  func.func @transform_14(%arg0: i32) -> (i32, i32) {
    %c0_i32 = arith.constant 0 : i32
    %c0_i32_0 = arith.constant 0 : i32
    %c0_i32_1 = arith.constant 0 : i32
    return %c0_i32, %c0_i32_0 : i32, i32
  }
  func.func @transform_15(%arg0: i32) -> (i32, i32, i32) {
    %c0_i32 = arith.constant 0 : i32
    %c0_i32_0 = arith.constant 0 : i32
    %c0_i32_1 = arith.constant 0 : i32
    return %arg0, %c0_i32, %c0_i32_0 : i32, i32, i32
  }
}

</mosaic_0001>

<bundles_post_ra>
// kernel: cnn_fashion_forward.1
= control target key start
LH: loop header
LB: loop body
LE: loop exit
PB: predicated region body
PF: predicated region fallthrough
CT: control target
= control target key end

     0   :  { %s2710_s0 = inlined_call_operand.vmem [shape: f32[2,1,28,28], index: 0, kind: input, shape index: {}]   ;;  %s2711_s1 = inlined_call_operand.hbm [shape: f32[5,28,144], index: 1, kind: input, shape index: {}]   ;;  %s2712_s2 = inlined_call_operand.vmem [shape: f32[1,144], index: 2, kind: input, shape index: {}]   ;;  %s2713_s3 = inlined_call_operand.hbm [shape: f32[5,72,96], index: 3, kind: input, shape index: {}]   ;;  %s2714_s4 = inlined_call_operand.vmem [shape: f32[1,96], index: 4, kind: input, shape index: {}]   ;;  %s2715_s5 = inlined_call_operand.vmem [shape: f32[12,23], index: 5, kind: input, shape index: {}]   ;;  %s2716_s6 = inlined_call_operand.hbm [shape: f32[143,72], index: 6, kind: input, shape index: {}]   ;;  %s2717_s7 = inlined_call_operand.vmem [shape: f32[4,7], index: 7, kind: input, shape index: {}]   ;;  %s2718_s8 = inlined_call_operand.vmem [shape: f32[95,48], index: 8, kind: input, shape index: {}]   ;;  %s2719_s9 = inlined_call_operand.vmem [shape: f32[4,48,128], index: 9, kind: input, shape index: {}]   ;;  %s2720_s10 = inlined_call_operand.vmem [shape: f32[1,128], index: 10, kind: input, shape index: {}]   ;;  %s2721_s11 = inlined_call_operand.hbm [shape: f32[128,128], index: 11, kind: input, shape index: {}]   ;;  %s2722_s12 = inlined_call_operand.vmem [shape: f32[1,128], index: 12, kind: input, shape index: {}]   ;;  %s2723_s13 = inlined_call_operand.hbm [shape: f32[128,128], index: 13, kind: input, shape index: {}]   ;;  %s2724_s14 = inlined_call_operand.vmem [shape: f32[1,128], index: 14, kind: input, shape index: {}]   ;;  %s2725_s15 = inlined_call_operand.hbm [shape: f32[2,1,128], index: 15, kind: output, shape index: {}]  }
   0x1   :  { %2736 = sst [smem:[#allocation24_spill]] %s2711_s1 }
   0x2   :  { %2737 = sst [smem:[#allocation25_spill]] %s2713_s3 }
   0x3   :  { %2738 = sst [smem:[#allocation26_spill]] %s2721_s11 }
   0x4   :  { %2739 = sst [smem:[#allocation27_spill]] %s2724_s14 }
   0x5   :  { %2740 = sst [smem:[#allocation28_spill]] %s2725_s15 }
   0x6   :  { %20 = vsyncpa [#allocation3], 0 }
   0x7   :  { %21 = vsyncpa [#allocation6], 0 }
   0x8   :  { %22 = vsyncpa [#allocation9], 0 }
   0x9   :  { %23 = vsyncpa [#allocation4], 0 }
   0xa   :  { %25 = vsyncpa [#allocation4 + $0x1], 0  ;;  %s2312_s18 = smov 0   ;;  %s2314_s19 = smov 0  }
   0xb   :  { %s2316_s20 = smov 0   ;;  %s2318_s21 = smov 0  }
   0xc LB: > { %2741 = sst [smem:[#allocation16_spill]] %s2208_s18  ;;  %s2333_s22 = sadd.s32 4294967295, %s2220_s21   ;;  %s2220_s21 = sphi %s2318_s21, %s2763_s21   ;;  %s2216_s20 = sphi %s2316_s20, %s2766_s20   ;;  %s2212_s19 = sphi %s2314_s19, %s2765_s19   ;;  %s2208_s18 = sphi %s2312_s18, %s2764_s18  }
   0xd   : > { %2742 = sst [smem:[#allocation17_spill]] %s2212_s19  ;;  %s1793_s23 = sadd.s32 4294967294, %s2220_s21  }
   0xe   : > { %2743 = sst [smem:[#allocation18_spill]] %s2216_s20  ;;  %s2337_s24 = sadd.s32 1, %s2220_s21  }
   0xf   : > { %2744 = sst [smem:[#allocation19_spill]] %s2220_s21  ;;  %s358_s25 = sadd.s32 1, %s2216_s20 }
  0x10   : > { %2745 = sst [smem:[#allocation20_spill]] %s2337_s24  ;;  %s355_s26 = ssub.s32 %s2220_s21, %s2337_s24 }
  0x11   : > { %p368_p0 = scmp.ne.s32.totalorder %s2216_s20, %s2212_s19  ;;  %p356_p1 = scmp.eq.s32.totalorder %s355_s26, 0 }
  0x12   : > { %p369_p2 = scmp.eq.s32.totalorder %s2333_s22, 1  ;;  %p374_p3 = scmp.ne.s32.totalorder %s2212_s19, %s2208_s18 }
  0x13   : > { %p375_p4 = scmp.eq.s32.totalorder %s1793_s23, 1  ;;  %p1794_p7 = scmp.ge.s32.totalorder %s2220_s21, 1 }
  0x14   : > { %s2348_s27 = scalar_select %p356_p1, %s2216_s20, %s358_s25  }
  0x15   : > { %p2350_p5 = por %p369_p2, %p368_p0  ;;  %p2354_p6 = por %p375_p4, %p374_p3 }
  0x16   : > { %2746 = sst [smem:[#allocation21_spill]] %s2348_s27  ;;  %p382_p8 = scmp.lt.s32.totalorder %s2220_s21, 3 }
  0x17   : > { %s2747_s28 = scalar_select %p2350_p5, 1, 0 }
  0x18   : > { %s2749_s29 = scalar_select %p2354_p6, 1, 0 }
  0x19   : > { %2748 = sst [smem:[#allocation22_spill]] %s2747_s28  ;;  %p1938_p9 = scmp.eq.s32.totalorder %s2333_s22, 0 }
  0x1a   : > { %2750 = sst [smem:[#allocation23_spill]] %s2749_s29  ;;  %p2361_p10 = pnand %p1794_p7, %p382_p8 }
  0x1b   : > { %s2752_s3 = sld [smem:[#allocation25_spill]]  ;;  %s2222_s25 = smov [#allocation5]  }
  0x1c   : > { %p1918_p11 = pneg %p2361_p10  ;;  %s412_s26 = sshll.u32 %s2222_s25, 4  ;;  %s413_s26 = int_to_ptr.vmem [resolvable:$true] %s412_s26 }
  0x1d   : > { %s2754_s11 = sld [smem:[#allocation26_spill]]  ;;  %s2223_s16 = smov 128  }
  0x1e   : > { %p2372_p12 = pnand %p1938_p9, %p1918_p11  ;;  %s2224_s17 = smov 8  }
  0x1f   : > { %s2755_s1 = sld [smem:[#allocation24_spill]]  ;;  %s2226_s20 = smov [#allocation2]  }
  0x20   : > { %s395_s24 = sshll.u32 %s2226_s20, 4  ;;  %s430_s14 = sshll.u32 %s2716_s6, 4  ;;  %s396_s24 = int_to_ptr.vmem [resolvable:$true] %s395_s24  ;;  %s431_s14 = int_to_ptr.hbm [resolvable:$true] %s430_s14 }
  0x21   : > { %s410_s23 = sshll.u32 %s2752_s3, 4  ;;  %s2225_s3 = smov [#allocation8]   ;;  %s411_s23 = int_to_ptr.hbm [resolvable:$true] %s410_s23 }
  0x22   : > { %1924 = dma.hbm_to_vmem [thread:$0]  (!%p2372_p12), %s411_s23, 5760, %s413_s26, [#allocation6], %s2223_s16, %s2223_s16, %s2224_s17  }
  0x23   : > { %s456_s29 = sshll.u32 %s2754_s11, 4  ;;  %s458_s25 = sshll.u32 %s2225_s3, 4  ;;  %s457_s29 = int_to_ptr.hbm [resolvable:$true] %s456_s29  ;;  %s459_s25 = int_to_ptr.vmem [resolvable:$true] %s458_s25 }
  0x24   : > { %1930 = dma.hbm_to_vmem [thread:$0]  (!%p2372_p12), %s457_s29, 2048, %s459_s25, [#allocation9], %s2223_s16, %s2223_s16, %s2224_s17  }
  0x25   : > { %s393_s15 = sshll.u32 %s2755_s1, 4  ;;  %s2227_s23 = smov 256   ;;  %s394_s15 = int_to_ptr.hbm [resolvable:$true] %s393_s15 }
  0x26   : > { %s2228_s26 = smov 16   ;;  %s2229_s3 = smov [#allocation7]  }
  0x27   : > { %1921 = dma.hbm_to_vmem [thread:$0]  (!%p2372_p12), %s394_s15, 5120, %s396_s24, [#allocation3], %s2227_s23, %s2227_s23, %s2228_s26  }
  0x28   : > { %s432_s18 = sshll.u32 %s2229_s3, 4  ;;  %s473_s19 = sshll.u32 %s2723_s13, 4  ;;  %s433_s18 = int_to_ptr.vmem [resolvable:$true] %s432_s18  ;;  %s474_s19 = int_to_ptr.hbm [resolvable:$true] %s473_s19 }
  0x29   : > { %1927 = dma.hbm_to_vmem [thread:$0]  (!%p2372_p12), %s431_s14, 2304, %s433_s18, [#allocation6], %s2223_s16, %s2223_s16, %s2224_s17  }
  0x2a   : > { %s2230_s29 = smov [#allocation10]   ;;  %502 = sbr.rel (%p2361_p10) target bundleno = 1850 (0x73a), region = 80 }
  0x2b   : > { %s475_s25 = sshll.u32 %s2230_s29, 4  ;;  %s476_s25 = int_to_ptr.vmem [resolvable:$true] %s475_s25 }
  0x2c   : > { %1933 = dma.hbm_to_vmem [thread:$0]  (!%p2372_p12), %s474_s19, 2048, %s476_s25, [#allocation9], %s2223_s16, %s2223_s16, %s2224_s17  }
  0x2f   : > { %2191 = dma.done.wait (%p1938_p9), [#allocation3], 5120  }
  0x30   : > { %2193 = vsyncadd (%p1938_p9), [#allocation3], 4294962176 }
  0x31   : > { %2195 = dma.done.wait (%p1938_p9), [#allocation6], 8064  }
  0x32   : > { %2197 = vsyncadd (%p1938_p9), [#allocation6], 4294959232 }
  0x33   : > { %2199 = dma.done.wait (%p1938_p9), [#allocation9], 4096  }
  0x34   : > { %2201 = vsyncadd (%p1938_p9), [#allocation9], 4294963200  ;;  %p570_p13 = scmp.lt.s32.totalorder %s2333_s22, 1  ;;  %vm615_vm0 = vcmask 1043456   ;;  %v594_v0 = vld [vmem:[#allocation2 + $0x70] sm:$0xf] }
  0x35   : > { %v595_v1 = vld [vmem:[#allocation2 + $0x78] sm:$0xf]  ;;  %v585_v2 = vld [vmem:[#allocation2 + $0x30] sm:$0xf]  ;;  %1809 = vmatpush.msk.msra.mxu0 %vm615_vm0, %v594_v0  ;;  %v592_v4 = vld [vmem:[#allocation2 + $0x60] sm:$0xff]  ;;  %vm600_vm1 = vcmask 1046528  }
  0x36   : > { %s571_s1 = scalar_select %p570_p13, %s2333_s22, 1  ;;  %1892 = vmatpush.msk.msra.mxu1 %vm615_vm0, %v595_v1  ;;  %v586_v3 = vld [vmem:[#allocation2 + $0x38] sm:$0xf]  ;;  %v593_v5 = vld [vmem:[#allocation2 + $0x68] sm:$0xff]  ;;  %1817 = vmatpush.msk.msra.mxu2 %vm615_vm0, %v585_v2  ;;  %v583_v6 = vld [vmem:[#allocation2 + $0x20] sm:$0xff]  ;;  %vm608_vm2 = vcmask 228352  }
  0x37   : > { %1821 = vmatpush.msk.msra.mxu3 %vm615_vm0, %v586_v3  ;;  %v584_v7 = vld [vmem:[#allocation2 + $0x28] sm:$0xff]  ;;  %v590_v8 = vld [vmem:[#allocation2 + $0x50] sm:$0xff]  ;;  %635 = vmatpush.msra.mxu0 %v592_v4  ;;  %v591_v9 = vld [vmem:[#allocation2 + $0x58] sm:$0xff]  ;;  %vm747_vm3 = vcmask 1045504   ;;  %vm834_vm4 = vcmask 1044480   ;;  %vm1046_vm5 = vcmask 187392  }
  0x38   : > { %s1891_s11 = sshll.u32 %s571_s1, 5  ;;  %1893 = vmatpush.msra.mxu1 %v593_v5  ;;  %v581_v10 = vld [vmem:[#allocation2 + $0x10] sm:$0xff]  ;;  %v582_v11 = vld [vmem:[#allocation2 + $0x18] sm:$0xff]  ;;  %699 = vmatpush.msra.mxu2 %v583_v6  ;;  %v588_v12 = vld [vmem:[#allocation2 + $0x40] sm:$0xff]  ;;  %s2231_s24 = smov 127   ;;  %vm1146_vm6 = vcmask 121856  }
  0x39   : > { %s574_s19 = scalar_lea.vmem %s2710_s0, %s1891_s11  ;;  %725 = vmatpush.msra.mxu3 %v584_v7  ;;  %v2421_v13 = vld [vmem:[#allocation2 + $0x48] sm:$0xff]  ;;  %v579_v14 = vld [vmem:[#allocation2] sm:$0xff]  ;;  %636 = vmatpush.msra.mxu0 %v590_v8  ;;  %v746_v25 = vld [vmem:[#allocation2 + $0xb8] sm:$0xf]  ;;  %vm1117_vm7 = vcmask 1039360   ;;  %vm1226_vm8 = vcmask 588800  }
  0x3a   : > { %1894 = vmatpush.msra.mxu1 %v591_v9  ;;  %v580_v15 = vld [vmem:[#allocation2 + $0x8] sm:$0xff]  ;;  %v2423_v16 = vld [vmem:[%s574_s19] sm:$0xff]  ;;  %700 = vmatpush.msra.mxu2 %v581_v10  ;;  %v2429_v20 = vld [vmem:[%s574_s19 + $0x10] sm:$0xff]  ;;  %vm1390_vm9 = vcmask 56320   ;;  %vm1434_vm10 = vcmask 777216   ;;  %vm1468_vm11 = vcmask 392192  }
  0x3b   : > { %v2425_v17 = vld [vmem:[%s574_s19 + $0x8] sm:$0xff]  ;;  %726 = vmatpush.msra.mxu3 %v582_v11  ;;  %v601_v18 = vrot.slane %v2423_v16, 1  ;;  %v2431_v21 = vld [vmem:[%s574_s19 + $0x18] sm:$0xf]  ;;  %637 = vmatpush.msra.mxu0 %v588_v12  ;;  %v604_v22 = vrot.slane %v2429_v20, 1  ;;  %v830_v31 = vld [vmem:[#allocation2 + $0xe0] sm:$0xff] }
  0x3c   : > { %v602_v19 = vrot.slane %v2425_v17, 1  ;;  %1895 = vmatpush.msra.mxu1 %v2421_v13  ;;  %v606_v23 = vrot.slane %v2431_v21, 1  ;;  %701 = vmatpush.msra.mxu2 %v579_v14  ;;  %v833_v27 = vld [vmem:[#allocation2 + $0xf8] sm:$0xf]  ;;  %v744_v28 = vld [vmem:[#allocation2 + $0xa8] sm:$0xff]  ;;  %v748_v33 = vrot.slane %v2423_v16, 2 }
  0x3d   : > { %727 = vmatpush.msra.mxu3 %v580_v15  ;;  %1818 = vmatmul.msk.f32.vlgmr.msra.gmra.mxu2 %vm608_vm2, %v2423_v16  ;;  %v832_v29 = vld [vmem:[#allocation2 + $0xf0] sm:$0xf]  ;;  %v831_v30 = vld [vmem:[#allocation2 + $0xe8] sm:$0xff]  ;;  %v742_v32 = vld [vmem:[#allocation2 + $0x98] sm:$0xff]  ;;  %v749_v34 = vrot.slane %v2425_v17, 2  ;;  %v751_v45 = vrot.slane %v2429_v20, 2 }
  0x3e   : > { %v2437_v24 = vsel %vm600_vm1, %v601_v18, %v602_v19  ;;  %v607_v26 = vsel %vm600_vm1, %v604_v22, %v606_v23  ;;  %1822 = vmatmul.msk.f32.vlgmr.msra.gmra.mxu3 %vm608_vm2, %v2423_v16  ;;  %1829 = vmatpush.msk.msrb.mxu1 %vm615_vm0, %v746_v25  ;;  %v829_v35 = vld [vmem:[#allocation2 + $0xd8] sm:$0xff]  ;;  %v828_v36 = vld [vmem:[#allocation2 + $0xd0] sm:$0xff]  ;;  %v740_v37 = vld [vmem:[#allocation2 + $0x88] sm:$0xff]  ;;  %v605_v38 = vsel %vm600_vm1, %v602_v19, %v604_v22  ;;  %v835_v52 = vrot.slane %v2423_v16, 3  ;;  %s2756_s29 = sld [smem:[#allocation17_spill]] }
  0x3f   : > { %1810 = vmatmul.msk.f32.vlgmr.msra.gmra.mxu0 %vm608_vm2, %v2437_v24  ;;  %1816 = vmatmul.msk.f32.vlgmr.msra.gmra.mxu1 %vm608_vm2, %v607_v26  ;;  %v2455_v39 = vsel %vm747_vm3, %v748_v33, %v749_v34  ;;  %v827_v40 = vld [vmem:[#allocation2 + $0xc8] sm:$0xff]  ;;  %v920_v41 = vld [vmem:[#allocation2 + $0x138] sm:$0xf]  ;;  %v745_v42 = vld [vmem:[#allocation2 + $0xb0] sm:$0xf]  ;;  %v752_v48 = vsel %vm747_vm3, %v749_v34, %v751_v45  ;;  %v836_v53 = vrot.slane %v2425_v17, 3 }
  0x40   : > { %1813 = vmatpush.msk.msrb.mxu0 %vm615_vm0, %v595_v1  ;;  %1837 = vmatpush.msk.msrb.mxu3 %vm615_vm0, %v833_v27  ;;  %v826_v43 = vld [vmem:[#allocation2 + $0xc0] sm:$0xff]  ;;  %v918_v44 = vld [vmem:[#allocation2 + $0x128] sm:$0xff]  ;;  %v916_v47 = vld [vmem:[#allocation2 + $0x118] sm:$0xff]  ;;  %v753_v54 = vrot.slane %v2431_v21, 2  ;;  %v838_v59 = vrot.slane %v2429_v20, 3  ;;  %v921_v60 = vrot.slane %v2423_v16, 4 }
  0x41   : > { %1833 = vmatpush.msk.msrb.mxu2 %vm615_vm0, %v832_v29  ;;  %806 = vmatpush.msrb.mxu1 %v744_v28  ;;  %v743_v46 = vld [vmem:[#allocation2 + $0xa0] sm:$0xff]  ;;  %v741_v49 = vld [vmem:[#allocation2 + $0x90] sm:$0xff]  ;;  %v914_v50 = vld [vmem:[#allocation2 + $0x108] sm:$0xff]  ;;  %v837_v55 = vsel %vm834_vm4, %v835_v52, %v836_v53  ;;  %v922_v61 = vrot.slane %v2425_v17, 4  ;;  %v840_v2 = vrot.slane %v2431_v21, 3  ;;  %v924_v3 = vrot.slane %v2429_v20, 4 }
  0x42   : > { %661 = vmatpush.msrb.mxu0 %v593_v5  ;;  %893 = vmatpush.msrb.mxu3 %v831_v30  ;;  %v739_v51 = vld [vmem:[#allocation2 + $0x80] sm:$0xff]  ;;  %v754_v56 = vsel %vm747_vm3, %v751_v45, %v753_v54  ;;  %v919_v57 = vld [vmem:[#allocation2 + $0x130] sm:$0xf]  ;;  %v839_v63 = vsel %vm834_vm4, %v836_v53, %v838_v59  ;;  %v926_v6 = vrot.slane %v2431_v21, 4  ;;  %s2757_s11 = sld [smem:[#allocation27_spill]]  ;;  %vm1662_vm12 = vcmask 1040384  }
  0x43   : > { %867 = vmatpush.msrb.mxu2 %v830_v31  ;;  %807 = vmatpush.msrb.mxu1 %v742_v32  ;;  %v917_v58 = vld [vmem:[#allocation2 + $0x120] sm:$0xff]  ;;  %v915_v62 = vld [vmem:[#allocation2 + $0x110] sm:$0xff]  ;;  %v923_v0 = vsel %vm615_vm0, %v921_v60, %v922_v61  ;;  %v841_v4 = vsel %vm834_vm4, %v838_v59, %v840_v2  ;;  %v925_v5 = vsel %vm615_vm0, %v922_v61, %v924_v3  ;;  %s2759_s28 = sld [smem:[#allocation28_spill]] }
  0x44   : > { %662 = vmatpush.msrb.mxu0 %v591_v9  ;;  %894 = vmatpush.msrb.mxu3 %v829_v35  ;;  %v913_v1 = vld [vmem:[#allocation2 + $0x100] sm:$0xff]  ;;  %v927_v7 = vsel %vm615_vm0, %v924_v3, %v926_v6  ;;  %s568_s14 = sand.u32 1, %s2756_s29  }
  0x45   : > { %868 = vmatpush.msrb.mxu2 %v828_v36  ;;  %808 = vmatpush.msrb.mxu1 %v740_v37  ;;  %v998_v34 = vld [vmem:[%s2712_s2] sm:$0x3]  ;;  %s569_s16 = scalar_lea.vmem [#allocation11], %s568_s14  ;;  %s1676_s20 = scalar_lea.sflag [#allocation4], %s568_s14 }
  0x46   : > { %1819 = vmatmul.msk.f32.gmra.mxu2 %vm608_vm2, %v2425_v17  ;;  %1823 = vmatmul.msk.f32.gmra.mxu3 %vm608_vm2, %v2425_v17  ;;  %v1000_v6 = vperm.slane %v998_v34, 0  ;;  %s1686_s17 = sshll.u32 %s569_s16, 4  ;;  %s1687_s17 = int_to_ptr.vmem [resolvable:$true] %s1686_s17 }
  0x47   : > { %1811 = vmatmul.msk.f32.gmra.mxu0 %vm608_vm2, %v605_v38  ;;  %1830 = vmatmul.msk.f32.vlgmr.msrb.gmra.mxu1 %vm608_vm2, %v2455_v39 }
  0x48   : > { %663 = vmatpush.msrb.mxu0 %v2421_v13  ;;  %895 = vmatpush.msrb.mxu3 %v827_v40 }
  0x49   : > { %1845 = vmatpush.msk.msra.mxu1 %vm615_vm0, %v920_v41  ;;  %869 = vmatpush.msrb.mxu2 %v826_v43  ;;  %s1684_s30 = scalar_lea.hbm %s2759_s28, %s2333_s22  ;;  %s2166_s22 = scalar_lea.hbm %s2759_s28, 2 }
  0x4a   : > { %1825 = vmatpush.msk.msra.mxu0 %vm615_vm0, %v745_v42 }
  0x4b   : > { %979 = vmatpush.msra.mxu1 %v918_v44 }
  0x4c   : > { %780 = vmatpush.msra.mxu0 %v743_v46 }
  0x4d   : > { %980 = vmatpush.msra.mxu1 %v916_v47 }
  0x4e   : > { %1820 = vmatmul.msk.f32.gmra.mxu2 %vm608_vm2, %v2429_v20  ;;  %1824 = vmatmul.msk.f32.gmra.mxu3 %vm608_vm2, %v2429_v20 }
  0x4f   : > { %1812 = vmatmul.msk.f32.gmra.mxu0 %vm608_vm2, %v607_v26  ;;  %1831 = vmatmul.msk.f32.gmra.mxu1 %vm608_vm2, %v752_v48 }
  0x50   : > { %781 = vmatpush.msra.mxu0 %v741_v49  ;;  %981 = vmatpush.msra.mxu1 %v914_v50 }
  0x52   : > { %782 = vmatpush.msra.mxu0 %v739_v51 }
  0x56   : > { %1838 = vmatmul.msk.f32.vlgmr.msrb.gmra.mxu3 %vm608_vm2, %v837_v55  ;;  %1834 = vmatmul.msk.f32.vlgmr.msrb.gmra.mxu2 %vm608_vm2, %v837_v55 }
  0x57   : > { %1814 = vmatmul.msk.f32.vlgmr.msrb.gmra.mxu0 %vm608_vm2, %v2437_v24  ;;  %1832 = vmatmul.msk.f32.gmra.mxu1 %vm608_vm2, %v754_v56 }
  0x58   : > { %1841 = vmatpush.msk.msrb.mxu0 %vm615_vm0, %v919_v57 }
  0x5a   : > { %953 = vmatpush.msrb.mxu0 %v917_v58 }
  0x5c   : > { %954 = vmatpush.msrb.mxu0 %v915_v62 }
  0x5e   : > { %1839 = vmatmul.msk.f32.gmra.mxu3 %vm608_vm2, %v839_v63  ;;  %1835 = vmatmul.msk.f32.gmra.mxu2 %vm608_vm2, %v839_v63  ;;  %v1044_v63 = vld [vmem:[%s2715_s5] sm:$0xff] }
  0x5f   : > { %1815 = vmatmul.msk.f32.gmra.mxu0 %vm608_vm2, %v605_v38  ;;  %1846 = vmatmul.msk.f32.vlgmr.msra.gmra.mxu1 %vm608_vm2, %v923_v0  ;;  %v1001_v38 = vperm.slane %v998_v34, 1 }
  0x60   : > { %955 = vmatpush.msrb.mxu0 %v913_v1 }
  0x66   : > { %1840 = vmatmul.msk.f32.gmra.mxu3 %vm608_vm2, %v841_v4  ;;  %1836 = vmatmul.msk.f32.gmra.mxu2 %vm608_vm2, %v841_v4 }
  0x67   : > { %1826 = vmatmul.msk.f32.vlgmr.msra.gmra.mxu0 %vm608_vm2, %v2455_v39  ;;  %1847 = vmatmul.msk.f32.gmra.mxu1 %vm608_vm2, %v925_v5 }
  0x6f   : > { %1827 = vmatmul.msk.f32.gmra.mxu0 %vm608_vm2, %v752_v48  ;;  %1848 = vmatmul.msk.f32.gmra.mxu1 %vm608_vm2, %v927_v7 }
  0x77   : > { %1828 = vmatmul.msk.f32.gmra.mxu0 %vm608_vm2, %v754_v56 }
  0x7f   : > { %1842 = vmatmul.msk.f32.vlgmr.msrb.gmra.mxu0 %vm608_vm2, %v923_v0 }
  0x87   : > { %1843 = vmatmul.msk.f32.gmra.mxu0 %vm608_vm2, %v925_v5 }
  0x8f   : > { %1844 = vmatmul.msk.f32.gmra.mxu0 %vm608_vm2, %v927_v7 }
  0xbc   : > { %v639_v8 = vpop.f32.mrf.mxu0  ;;  %v671_v9 = vpop.f32.mrf.mxu1 }
  0xc0   : > { %v703_v19 = vpop.f32.mrf.mxu2 }
  0xc1   : > { %v729_v10 = vpop.f32.mrf.mxu3  ;;  %v704_v56 = vadd.f32 %v703_v19, %v639_v8 }
  0xc4   : > { %v642_v11 = vpop.f32.mrf.mxu0  ;;  %v810_v12 = vpop.f32.mrf.mxu1 }
  0xc9   : > { %v732_v13 = vpop.f32.mrf.mxu3  ;;  %v706_v25 = vpop.f32.mrf.mxu2 }
  0xca   : > { %v707_v1 = vadd.f32 %v706_v25, %v642_v11 }
  0xcc   : > { %v2512_v14 = vpop.f32.mrf.mxu0  ;;  %v813_v15 = vpop.f32.mrf.mxu1 }
  0xd1   : > { %v735_v16 = vpop.f32.mrf.mxu3  ;;  %v709_v40 = vpop.f32.mrf.mxu2 }
  0xd2   : > { %v736_v31 = vadd.f32 %v735_v16, %v671_v9  ;;  %v1045_v9 = vld [vmem:[%s2715_s5 + $0x8] sm:$0xf] }
  0xd4   : > { %v665_v17 = vpop.f32.mrf.mxu0  ;;  %v816_v18 = vpop.f32.mrf.mxu1 }
  0xd5   : > { %v730_v24 = vadd.f32 %v729_v10, %v665_v17  ;;  %v824_v36 = vadd.f32 %v816_v18, %v736_v31 }
  0xd7   : > { %v820_v28 = vadd.f32 %v810_v12, %v730_v24  ;;  %v710_v12 = vadd.f32 %v709_v40, %v2512_v14  ;;  %v1140_v40 = vld [vmem:[#allocation7 + $0x60] sm:$0xff] }
  0xd9   : > { %v897_v20 = vpop.f32.mrf.mxu3  ;;  %v871_v52 = vpop.f32.mrf.mxu2 }
  0xda   : > { %v907_v32 = vadd.f32 %v897_v20, %v820_v28 }
  0xdc   : > { %v668_v21 = vpop.f32.mrf.mxu0  ;;  %v983_v23 = vpop.f32.mrf.mxu1 }
  0xdd   : > { %v733_v22 = vadd.f32 %v732_v13, %v668_v21  ;;  %v993_v37 = vadd.f32 %v983_v23, %v907_v32  ;;  %v1145_v32 = vld [vmem:[#allocation7 + $0x88] sm:$0x7f] }
  0xdf   : > { %v822_v26 = vadd.f32 %v813_v15, %v733_v22  ;;  %v1005_v44 = vadd.f32 %v1001_v38, %v993_v37  ;;  %v1143_v37 = vld [vmem:[#allocation7 + $0x78] sm:$0xff] }
  0xe0   : > { %1156 = vmatpush.msra.mxu0 %v1143_v37  ;;  %v1272_v37 = vld [vmem:[#allocation5 + $0x90] sm:$0xff] }
  0xe1   : > { %v900_v27 = vpop.f32.mrf.mxu3  ;;  %v1011_v49 = vmax.f32 %v1005_v44, 0.0  ;;  %v874_v3 = vpop.f32.mrf.mxu2  ;;  %v1136_v44 = vld [vmem:[#allocation7 + $0x40] sm:$0xff] }
  0xe2   : > { %v909_v29 = vadd.f32 %v900_v27, %v822_v26 }
  0xe3   : > { %v1025_v55 = vrot.slane %v1011_v49, 1 }
  0xe4   : > { %v784_v30 = vpop.f32.mrf.mxu0  ;;  %v986_v33 = vpop.f32.mrf.mxu1 }
  0xe5   : > { %v995_v35 = vadd.f32 %v986_v33, %v909_v29  ;;  %v819_v61 = vadd.f32 %v784_v30, %v704_v56 }
  0xe7   : > { %v1007_v41 = vadd.f32 %v1001_v38, %v995_v35  ;;  %v906_v2 = vadd.f32 %v871_v52, %v819_v61  ;;  %v1129_v52 = vld [vmem:[#allocation7 + $0x8] sm:$0xff] }
  0xe9   : > { %v903_v39 = vpop.f32.mrf.mxu3  ;;  %v1013_v47 = vmax.f32 %v1007_v41, 0.0  ;;  %v877_v17 = vpop.f32.mrf.mxu2  ;;  %v1139_v41 = vld [vmem:[#allocation7 + $0x58] sm:$0xff] }
  0xea   : > { %v911_v42 = vadd.f32 %v903_v39, %v824_v36  ;;  %v1144_v36 = vld [vmem:[#allocation7 + $0x80] sm:$0xff]  ;;  %v1141_v39 = vld [vmem:[#allocation7 + $0x68] sm:$0xff] }
  0xeb   : > { %v1026_v51 = vrot.slane %v1013_v47, 1 }
  0xec   : > { %v787_v43 = vpop.f32.mrf.mxu0  ;;  %v989_v45 = vpop.f32.mrf.mxu1 }
  0xed   : > { %v997_v46 = vadd.f32 %v989_v45, %v911_v42  ;;  %v1027_v60 = vsel %vm600_vm1, %v1025_v55, %v1026_v51  ;;  %v821_v4 = vadd.f32 %v787_v43, %v707_v1  ;;  %v1138_v42 = vld [vmem:[#allocation7 + $0x50] sm:$0xff]  ;;  %v1137_v43 = vld [vmem:[#allocation7 + $0x48] sm:$0xff]  ;;  %v1135_v45 = vld [vmem:[#allocation7 + $0x38] sm:$0xff] }
  0xee   : > { %v1039_v62 = vmax.f32 %v1011_v49, %v1027_v60  ;;  %v1131_v49 = vld [vmem:[#allocation7 + $0x18] sm:$0xff]  ;;  %v1208_v1 = vld [vmem:[#allocation5 + $0x30] sm:$0xff] }
  0xef   : > { %v1009_v48 = vadd.f32 %v1001_v38, %v997_v46  ;;  %v908_v7 = vadd.f32 %v874_v3, %v821_v4  ;;  %v1142_v38 = vld [vmem:[#allocation7 + $0x70] sm:$0xff]  ;;  %v1219_v3 = vld [vmem:[#allocation5 + $0x80] sm:$0xff]  ;;  %v1207_v4 = vld [vmem:[#allocation5 + $0x28] sm:$0xff] }
  0xf0   : > { %1157 = vmatpush.msra.mxu0 %v1142_v38  ;;  %v1134_v46 = vld [vmem:[#allocation7 + $0x30] sm:$0xff] }
  0xf1   : > { %v1015_v50 = vmax.f32 %v1009_v48, 0.0  ;;  %v1132_v48 = vld [vmem:[#allocation7 + $0x20] sm:$0xff]  ;;  %v1312_v38 = vld [vmem:[#allocation5 + $0xf8] sm:$0xff] }
  0xf2   : > { %1158 = vmatpush.msra.mxu0 %v1141_v39  ;;  %v1344_v39 = vld [vmem:[#allocation5 + $0x120] sm:$0xff] }
  0xf3   : > { %v1030_v54 = vrot.slane %v1015_v50, 1 }
  0xf4   : > { %v790_v53 = vpop.f32.mrf.mxu0  ;;  %1159 = vmatpush.msra.mxu0 %v1140_v40  ;;  %v1311_v40 = vld [vmem:[#allocation5 + $0xf0] sm:$0xff] }
  0xf5   : > { %v1043_v57 = vmax.f32 %v1015_v50, %v1030_v54  ;;  %v1031_v58 = vsel %vm600_vm1, %v1026_v51, %v1030_v54  ;;  %v823_v11 = vadd.f32 %v790_v53, %v710_v12  ;;  %v1130_v50 = vld [vmem:[#allocation7 + $0x10] sm:$0xff]  ;;  %v1128_v53 = vld [vmem:[#allocation7] sm:$0xff] }
  0xf6   : > { %v1041_v59 = vmax.f32 %v1013_v47, %v1031_v58  ;;  %1160 = vmatpush.msra.mxu0 %v1139_v41  ;;  %v1133_v47 = vld [vmem:[#allocation7 + $0x28] sm:$0xff]  ;;  %v1216_v12 = vld [vmem:[#allocation5 + $0x68] sm:$0xff] }
  0xf7   : > { %1852 = vmatpush.msk.msra.mxu3 %vm600_vm1, %v1043_v57  ;;  %v910_v19 = vadd.f32 %v877_v17, %v823_v11  ;;  %v1215_v11 = vld [vmem:[#allocation5 + $0x60] sm:$0xff]  ;;  %v1310_v41 = vld [vmem:[#allocation5 + $0xe8] sm:$0xff] }
  0xf8   : > { %1161 = vmatpush.msra.mxu0 %v1138_v42  ;;  %v1352_v17 = vld [vmem:[#allocation5 + $0x160] sm:$0xff] }
  0xf9   : > { %1096 = vmatpush.msra.mxu3 %v1041_v59  ;;  %v1309_v42 = vld [vmem:[#allocation5 + $0xe0] sm:$0xff] }
  0xfa   : > { %1162 = vmatpush.msra.mxu0 %v1137_v43  ;;  %v1308_v43 = vld [vmem:[#allocation5 + $0xd8] sm:$0xff] }
  0xfb   : > { %1097 = vmatpush.msra.mxu3 %v1039_v62 }
  0xfc   : > { %v957_v0 = vpop.f32.mrf.mxu0  ;;  %1853 = vmatmul.msk.f32.vlgmr.msra.gmra.mxu3 %vm1046_vm5, %v1044_v63  ;;  %1163 = vmatpush.msra.mxu0 %v1136_v44 }
  0xfd   : > { %v992_v5 = vadd.f32 %v957_v0, %v906_v2  ;;  %v1209_v0 = vld [vmem:[#allocation5 + $0x38] sm:$0xff]  ;;  %v1220_v2 = vld [vmem:[#allocation5 + $0x88] sm:$0xff] }
  0xfe   : > { %1164 = vmatpush.msra.mxu0 %v1135_v45  ;;  %1236 = vmatpush.msrb.mxu3 %v1220_v2 }
  0xff   : > { %v1004_v8 = vadd.f32 %v1000_v6, %v992_v5  ;;  %v1218_v5 = vld [vmem:[#allocation5 + $0x78] sm:$0xff] }
 0x100   : > { %1165 = vmatpush.msra.mxu0 %v1134_v46  ;;  %1237 = vmatpush.msrb.mxu3 %v1219_v3 }
 0x101   : > { %v1010_v15 = vmax.f32 %v1004_v8, 0.0  ;;  %v1217_v8 = vld [vmem:[#allocation5 + $0x70] sm:$0xff] }
 0x102   : > { %1166 = vmatpush.msra.mxu0 %v1133_v47  ;;  %1238 = vmatpush.msrb.mxu3 %v1218_v5  ;;  %v1991_v5 = vld [vmem:[%s2714_s4] ss:$0 sm:$0xff] }
 0x103   : > { %v1022_v20 = vrot.slane %v1010_v15, 1 }
 0x104   : > { %v960_v10 = vpop.f32.mrf.mxu0  ;;  %1854 = vmatmul.msk.f32.gmra.mxu3 %vm1046_vm5, %v1045_v9  ;;  %1167 = vmatpush.msra.mxu0 %v1132_v48 }
 0x105   : > { %v994_v13 = vadd.f32 %v960_v10, %v908_v7  ;;  %v1280_v7 = vld [vmem:[#allocation5 + $0xd0] sm:$0xff]  ;;  %v1205_v10 = vld [vmem:[#allocation5 + $0x18] sm:$0xff]  ;;  %1239 = vmatpush.msrb.mxu3 %v1217_v8 }
 0x106   : > { %1168 = vmatpush.msra.mxu0 %v1131_v49 }
 0x107   : > { %v1006_v16 = vadd.f32 %v1000_v6, %v994_v13  ;;  %v1204_v13 = vld [vmem:[#allocation5 + $0x10] sm:$0xff]  ;;  %1240 = vmatpush.msrb.mxu3 %v1216_v12 }
 0x108   : > { %1169 = vmatpush.msra.mxu0 %v1130_v50 }
 0x109   : > { %v1012_v18 = vmax.f32 %v1006_v16, 0.0  ;;  %v1202_v16 = vld [vmem:[#allocation5] sm:$0xff]  ;;  %1241 = vmatpush.msrb.mxu3 %v1215_v11  ;;  %v1433_v11 = vld [vmem:[%s2718_s8 + $0x58] sm:$0x7f] }
 0x10a   : > { %1170 = vmatpush.msra.mxu0 %v1129_v52 }
 0x10b   : > { %v1023_v21 = vrot.slane %v1012_v18, 1 }
 0x10c   : > { %v963_v22 = vpop.f32.mrf.mxu0  ;;  %1171 = vmatpush.msra.mxu0 %v1128_v53 }
 0x10d   : > { %v996_v23 = vadd.f32 %v963_v22, %v910_v19  ;;  %v1024_v24 = vsel %vm600_vm1, %v1022_v20, %v1023_v21  ;;  %v1214_v19 = vld [vmem:[#allocation5 + $0x58] sm:$0xff]  ;;  %v1278_v20 = vld [vmem:[#allocation5 + $0xc0] sm:$0xff]  ;;  %v1213_v22 = vld [vmem:[#allocation5 + $0x50] sm:$0xff] }
 0x10e   : > { %v1038_v25 = vmax.f32 %v1010_v15, %v1024_v24  ;;  %v1203_v15 = vld [vmem:[#allocation5 + $0x8] sm:$0xff]  ;;  %1242 = vmatpush.msrb.mxu3 %v1214_v19  ;;  %1865 = vmatpush.msk.msrb.mxu0 %vm600_vm1, %v1433_v11  ;;  %v1428_v19 = vld [vmem:[%s2718_s8 + $0x30] sm:$0xff] }
 0x10f   : > { %v1008_v26 = vadd.f32 %v1000_v6, %v996_v23  ;;  %v1206_v6 = vld [vmem:[#allocation5 + $0x20] sm:$0xff]  ;;  %v1277_v23 = vld [vmem:[#allocation5 + $0xb8] sm:$0xff]  ;;  %v1349_v24 = vld [vmem:[#allocation5 + $0x148] sm:$0xff] }
 0x110   : > { %1243 = vmatpush.msrb.mxu3 %v1213_v22  ;;  %v1425_v22 = vld [vmem:[%s2718_s8 + $0x18] sm:$0xff]  ;;  %v1635_v11 = vld [vmem:[#allocation10 + $0x50] sm:$0xff] }
 0x111   : > { %v1014_v27 = vmax.f32 %v1008_v26, 0.0  ;;  %v1276_v26 = vld [vmem:[#allocation5 + $0xb0] sm:$0xff] }
 0x113   : > { %v1028_v28 = vrot.slane %v1014_v27, 1 }
 0x115   : > { %v1042_v14 = vmax.f32 %v1014_v27, %v1028_v28  ;;  %v1029_v29 = vsel %vm600_vm1, %v1023_v21, %v1028_v28  ;;  %v1350_v21 = vld [vmem:[#allocation5 + $0x150] sm:$0xff]  ;;  %v1316_v27 = vld [vmem:[#allocation5 + $0x118] sm:$0xff]  ;;  %v1348_v28 = vld [vmem:[#allocation5 + $0x140] sm:$0xff] }
 0x116   : > { %v1040_v30 = vmax.f32 %v1012_v18, %v1029_v29  ;;  %v1351_v18 = vld [vmem:[#allocation5 + $0x158] sm:$0xff]  ;;  %v1315_v29 = vld [vmem:[#allocation5 + $0x110] sm:$0xff] }
 0x117   : > { %1849 = vmatpush.msk.msra.mxu2 %vm600_vm1, %v1042_v14  ;;  %v1275_v14 = vld [vmem:[#allocation5 + $0xa8] sm:$0xff] }
 0x119   : > { %1073 = vmatpush.msra.mxu2 %v1040_v30  ;;  %v1347_v30 = vld [vmem:[#allocation5 + $0x138] sm:$0xff] }
 0x11b   : > { %1074 = vmatpush.msra.mxu2 %v1038_v25  ;;  %v1212_v25 = vld [vmem:[#allocation5 + $0x48] sm:$0xff] }
 0x11c   : > { %1850 = vmatmul.msk.f32.vlgmr.msra.gmra.mxu2 %vm1046_vm5, %v1044_v63  ;;  %v1210_v63 = vld [vmem:[#allocation5 + $0x40] sm:$0xff]  ;;  %1244 = vmatpush.msrb.mxu3 %v1212_v25 }
 0x11d   : > { %1855 = vmatpush.msk.msrb.mxu2 %vm600_vm1, %v1145_v32  ;;  %1258 = vmatpush.msrb.mxu1 %v1210_v63  ;;  %v1314_v32 = vld [vmem:[#allocation5 + $0x108] sm:$0xff] }
 0x11e   : > { %1329 = vmatpush.msra.mxu3 %v1316_v27  ;;  %v1467_v27 = vld [vmem:[%s2719_s9 + $0x28] sm:$0xff] }
 0x11f   : > { %1194 = vmatpush.msrb.mxu2 %v1144_v36  ;;  %1259 = vmatpush.msrb.mxu1 %v1209_v0  ;;  %v1345_v36 = vld [vmem:[#allocation5 + $0x128] sm:$0xff] }
 0x120   : > { %1330 = vmatpush.msra.mxu3 %v1315_v29  ;;  %v1465_v29 = vld [vmem:[%s2719_s9 + $0x18] sm:$0xff] }
 0x121   : > { %1260 = vmatpush.msrb.mxu1 %v1208_v1  ;;  %1293 = vmatpush.msra.mxu2 %v1280_v7 }
 0x122   : > { %1331 = vmatpush.msra.mxu3 %v1314_v32  ;;  %v1464_v32 = vld [vmem:[%s2719_s9 + $0x10] sm:$0xff] }
 0x123   : > { %1261 = vmatpush.msrb.mxu1 %v1207_v4 }
 0x124   : > { %1851 = vmatmul.msk.f32.gmra.mxu2 %vm1046_vm5, %v1045_v9  ;;  %v1279_v9 = vld [vmem:[#allocation5 + $0xc8] sm:$0xff] }
 0x125   : > { %1262 = vmatpush.msrb.mxu1 %v1206_v6  ;;  %1294 = vmatpush.msra.mxu2 %v1279_v9 }
 0x127   : > { %1263 = vmatpush.msrb.mxu1 %v1205_v10  ;;  %1295 = vmatpush.msra.mxu2 %v1278_v20  ;;  %v1427_v20 = vld [vmem:[%s2718_s8 + $0x28] sm:$0xff] }
 0x129   : > { %1264 = vmatpush.msrb.mxu1 %v1204_v13  ;;  %1296 = vmatpush.msra.mxu2 %v1277_v23  ;;  %v1389_v13 = vld [vmem:[%s2717_s7] sm:$0xf]  ;;  %v1424_v23 = vld [vmem:[%s2718_s8 + $0x10] sm:$0xff] }
 0x12b   : > { %1265 = vmatpush.msrb.mxu1 %v1203_v15  ;;  %1297 = vmatpush.msra.mxu2 %v1276_v26  ;;  %v1432_v15 = vld [vmem:[%s2718_s8 + $0x50] sm:$0xff]  ;;  %v1422_v26 = vld [vmem:[%s2718_s8] sm:$0xff] }
 0x12c   : > { %1446 = vmatpush.msrb.mxu0 %v1432_v15  ;;  %v1634_v15 = vld [vmem:[#allocation10 + $0x48] sm:$0xff] }
 0x12d   : > { %1266 = vmatpush.msrb.mxu1 %v1202_v16  ;;  %1298 = vmatpush.msra.mxu2 %v1275_v14  ;;  %v1431_v16 = vld [vmem:[%s2718_s8 + $0x48] sm:$0xff]  ;;  %v1873_v14 = vld [vmem:[%s2719_s9 + $0x58] sm:$0xff] }
 0x12e   : > { %1447 = vmatpush.msrb.mxu0 %v1431_v16 }
 0x12f   : > { %1365 = vmatpush.msra.mxu1 %v1352_v17  ;;  %v1430_v17 = vld [vmem:[%s2718_s8 + $0x40] sm:$0xff] }
 0x130   : > { %1448 = vmatpush.msrb.mxu0 %v1430_v17  ;;  %v1633_v17 = vld [vmem:[#allocation10 + $0x40] sm:$0xff] }
 0x131   : > { %1366 = vmatpush.msra.mxu1 %v1351_v18  ;;  %v1429_v18 = vld [vmem:[%s2718_s8 + $0x38] sm:$0xff] }
 0x132   : > { %1449 = vmatpush.msrb.mxu0 %v1429_v18  ;;  %v1632_v18 = vld [vmem:[#allocation10 + $0x38] sm:$0xff] }
 0x133   : > { %1367 = vmatpush.msra.mxu1 %v1350_v21  ;;  %v1426_v21 = vld [vmem:[%s2718_s8 + $0x20] sm:$0xff] }
 0x134   : > { %1450 = vmatpush.msrb.mxu0 %v1428_v19  ;;  %v1631_v19 = vld [vmem:[#allocation10 + $0x30] sm:$0xff] }
 0x135   : > { %1368 = vmatpush.msra.mxu1 %v1349_v24  ;;  %v1423_v24 = vld [vmem:[%s2718_s8 + $0x8] sm:$0xff] }
 0x136   : > { %1451 = vmatpush.msrb.mxu0 %v1427_v20  ;;  %v1461_v20 = vld [vmem:[%s2720_s10] sm:$0x1] }
 0x137   : > { %1369 = vmatpush.msra.mxu1 %v1348_v28  ;;  %v1466_v28 = vld [vmem:[%s2719_s9 + $0x20] sm:$0xff] }
 0x138   : > { %1452 = vmatpush.msrb.mxu0 %v1426_v21  ;;  %v1630_v21 = vld [vmem:[#allocation10 + $0x28] sm:$0xff] }
 0x139   : > { %1370 = vmatpush.msra.mxu1 %v1347_v30  ;;  %v1872_v30 = vld [vmem:[%s2719_s9 + $0x50] sm:$0xff] }
 0x13a   : > { %1453 = vmatpush.msrb.mxu0 %v1425_v22 }
 0x13c   : > { %1454 = vmatpush.msrb.mxu0 %v1424_v23 }
 0x13e   : > { %1455 = vmatpush.msrb.mxu0 %v1423_v24  ;;  %v1629_v24 = vld [vmem:[#allocation10 + $0x20] sm:$0xff] }
 0x140   : > { %1456 = vmatpush.msrb.mxu0 %v1422_v26 }
 0x17f   : > { %v1099_v31 = vpop.f32.mrf.mxu3 }
 0x180   : > { %1111 = vrot.lane.b32.xlu0 %v1099_v31, %s2231_s24 }
 0x187   : > { %v1102_v33 = vpop.f32.mrf.mxu3 }
 0x188   : > { %1115 = vrot.lane.b32.xlu1 %v1102_v33, %s2231_s24 }
 0x19f   : > { %v1076_v34 = vpop.f32.mrf.mxu2 }
 0x1a0   : > { %1109 = vrot.lane.b32.xlu0 %v1076_v34, %s2231_s24 }
 0x1a7   : > { %v1079_v35 = vpop.f32.mrf.mxu2 }
 0x1a8   : > { %1113 = vrot.lane.b32.xlu1 %v1079_v35, %s2231_s24 }
 0x1f2   : > { %v1112_v51 = vpop.permute.xlu0 %1111 }
 0x1f3   : > { %v1125_v54 = vmax.f32 %v1099_v31, %v1112_v51  ;;  %v1274_v31 = vld [vmem:[#allocation5 + $0xa0] sm:$0xff] }
 0x1f4   : > { %1299 = vmatpush.msra.mxu2 %v1274_v31  ;;  %v1871_v31 = vld [vmem:[%s2719_s9 + $0x48] sm:$0xff] }
 0x1f5   : > { %1856 = vmatmul.msk.f32.vlgmr.msrb.gmra.mxu2 %vm1146_vm6, %v1125_v54 }
 0x1fa   : > { %v1116_v55 = vpop.permute.xlu1 %1115 }
 0x1fb   : > { %v1127_v56 = vmax.f32 %v1102_v33, %v1116_v55  ;;  %v1346_v33 = vld [vmem:[#allocation5 + $0x130] sm:$0xff] }
 0x1fc   : > { %1371 = vmatpush.msra.mxu1 %v1346_v33  ;;  %v1870_v33 = vld [vmem:[%s2719_s9 + $0x40] sm:$0xff] }
 0x1fd   : > { %1857 = vmatmul.msk.f32.gmra.mxu2 %vm1146_vm6, %v1127_v56 }
 0x1fe   : > { %1372 = vmatpush.msra.mxu1 %v1345_v36  ;;  %v1880_v36 = vld [vmem:[%s2719_s9 + $0x88] sm:$0xff] }
 0x200   : > { %1373 = vmatpush.msra.mxu1 %v1344_v39 }
 0x212   : > { %v1110_v57 = vpop.permute.xlu0 %1109 }
 0x213   : > { %v1118_v58 = vsel %vm1117_vm7, %v1110_v57, %v1112_v51 }
 0x214   : > { %v1124_v59 = vmax.f32 %v1076_v34, %v1118_v58  ;;  %v1273_v34 = vld [vmem:[#allocation5 + $0x98] sm:$0xff] }
 0x215   : > { %1300 = vmatpush.msra.mxu2 %v1273_v34  ;;  %v1463_v34 = vld [vmem:[%s2719_s9 + $0x8] sm:$0xff] }
 0x216   : > { %1172 = vmatmul.f32.vlgmr.msra.gmra.mxu0 %v1124_v59 }
 0x217   : > { %1301 = vmatpush.msra.mxu2 %v1272_v37  ;;  %v1879_v37 = vld [vmem:[%s2719_s9 + $0x80] sm:$0xff] }
 0x21a   : > { %v1114_v60 = vpop.permute.xlu1 %1113 }
 0x21b   : > { %v1119_v61 = vsel %vm1117_vm7, %v1114_v60, %v1116_v55 }
 0x21c   : > { %v1126_v62 = vmax.f32 %v1079_v35, %v1119_v61  ;;  %v1313_v35 = vld [vmem:[#allocation5 + $0x100] sm:$0xff] }
 0x21d   : > { %1332 = vmatpush.msra.mxu3 %v1313_v35  ;;  %v1462_v35 = vld [vmem:[%s2719_s9] sm:$0xff] }
 0x21e   : > { %1175 = vmatmul.f32.gmra.mxu0 %v1126_v62 }
 0x21f   : > { %1333 = vmatpush.msra.mxu3 %v1312_v38  ;;  %v1878_v38 = vld [vmem:[%s2719_s9 + $0x78] sm:$0xff] }
 0x221   : > { %1334 = vmatpush.msra.mxu3 %v1311_v40 }
 0x223   : > { %1335 = vmatpush.msra.mxu3 %v1310_v41  ;;  %v1869_v41 = vld [vmem:[%s2719_s9 + $0x38] sm:$0xff] }
 0x225   : > { %1336 = vmatpush.msra.mxu3 %v1309_v42  ;;  %v1877_v42 = vld [vmem:[%s2719_s9 + $0x70] sm:$0xff] }
 0x227   : > { %1337 = vmatpush.msra.mxu3 %v1308_v43  ;;  %v1868_v43 = vld [vmem:[%s2719_s9 + $0x30] sm:$0xff] }
 0x278   : > { %v1196_v44 = vpop.f32.mrf.mxu2 }
 0x280   : > { %v1199_v47 = vpop.f32.mrf.mxu2 }
 0x293   : > { %v1173_v45 = vpop.f32.mrf.mxu0 }
 0x294   : > { %v1197_v46 = vadd.f32 %v1196_v44, %v1173_v45  ;;  %v1876_v44 = vld [vmem:[%s2719_s9 + $0x68] sm:$0xff]  ;;  %v1875_v45 = vld [vmem:[%s2719_s9 + $0x60] sm:$0xff] }
 0x296   : > { %1859 = vmatmul.msk.f32.vlgmr.msrb.gmra.mxu1 %vm1226_vm8, %v1197_v46  ;;  %v1223_v50 = vrot.slane %v1197_v46, 1  ;;  %v1281_v51 = vrot.slane %v1197_v46, 2  ;;  %v1353_v55 = vrot.slane %v1197_v46, 4  ;;  %v1317_v60 = vrot.slane %v1197_v46, 3  ;;  %v1602_v46 = vld [vmem:[#allocation8 + $0x78] sm:$0xff] }
 0x297   : > { %1513 = vmatpush.msrb.mxu1 %v1873_v14 }
 0x299   : > { %1514 = vmatpush.msrb.mxu1 %v1872_v30 }
 0x29b   : > { %v1176_v48 = vpop.f32.mrf.mxu0  ;;  %1515 = vmatpush.msrb.mxu1 %v1871_v31  ;;  %v1627_v31 = vld [vmem:[#allocation10 + $0x10] sm:$0xff] }
 0x29c   : > { %v1200_v49 = vadd.f32 %v1199_v47, %v1176_v48  ;;  %v1601_v47 = vld [vmem:[#allocation8 + $0x70] sm:$0xff]  ;;  %v1600_v48 = vld [vmem:[#allocation8 + $0x68] sm:$0xff] }
 0x29d   : > { %1516 = vmatpush.msrb.mxu1 %v1870_v33  ;;  %v1625_v33 = vld [vmem:[#allocation10] sm:$0xff] }
 0x29e   : > { %v1224_v52 = vrot.slane %v1200_v49, 1  ;;  %v1282_v53 = vrot.slane %v1200_v49, 2  ;;  %v1354_v54 = vrot.slane %v1200_v49, 4  ;;  %v1318_v59 = vrot.slane %v1200_v49, 3  ;;  %v1887_v49 = vld [vmem:[%s2719_s9 + $0xb8] sm:$0xff] }
 0x29f   : > { %1517 = vmatpush.msrb.mxu1 %v1869_v41 }
 0x2a0   : > { %v1225_v56 = vsel %vm600_vm1, %v1223_v50, %v1224_v52  ;;  %v1283_v57 = vsel %vm747_vm3, %v1281_v51, %v1282_v53  ;;  %v1355_v58 = vsel %vm615_vm0, %v1353_v55, %v1354_v54  ;;  %v1319_v61 = vsel %vm834_vm4, %v1317_v60, %v1318_v59  ;;  %v1886_v52 = vld [vmem:[%s2719_s9 + $0xb0] sm:$0xff]  ;;  %v1885_v53 = vld [vmem:[%s2719_s9 + $0xa8] sm:$0xff]  ;;  %v1884_v54 = vld [vmem:[%s2719_s9 + $0xa0] sm:$0xff] }
 0x2a1   : > { %1858 = vmatmul.msk.f32.vlgmr.msrb.gmra.mxu3 %vm1226_vm8, %v1225_v56  ;;  %1860 = vmatmul.msk.f32.vlgmr.msra.gmra.mxu2 %vm1226_vm8, %v1283_v57  ;;  %v1883_v56 = vld [vmem:[%s2719_s9 + $0x98] sm:$0xff]  ;;  %v1882_v57 = vld [vmem:[%s2719_s9 + $0x90] sm:$0xff] }
 0x2a2   : > { %1862 = vmatmul.msk.f32.vlgmr.msra.gmra.mxu1 %vm1226_vm8, %v1355_v58  ;;  %1482 = vmatpush.msrb.mxu3 %v1467_v27  ;;  %v1599_v59 = vld [vmem:[#allocation8 + $0x60] sm:$0xff]  ;;  %v1598_v60 = vld [vmem:[#allocation8 + $0x58] sm:$0xff] }
 0x2a3   : > { %1518 = vmatpush.msrb.mxu1 %v1868_v43 }
 0x2a4   : > { %1483 = vmatpush.msrb.mxu3 %v1466_v28 }
 0x2a5   : > { %1604 = vmatpush.msra.mxu1 %v1602_v46 }
 0x2a6   : > { %1484 = vmatpush.msrb.mxu3 %v1465_v29 }
 0x2a7   : > { %1605 = vmatpush.msra.mxu1 %v1601_v47 }
 0x2a8   : > { %1485 = vmatpush.msrb.mxu3 %v1464_v32  ;;  %v1626_v32 = vld [vmem:[#allocation10 + $0x8] sm:$0xff] }
 0x2a9   : > { %1861 = vmatmul.msk.f32.vlgmr.msra.gmra.mxu3 %vm1226_vm8, %v1319_v61  ;;  %1606 = vmatpush.msra.mxu1 %v1600_v48  ;;  %v1597_v61 = vld [vmem:[#allocation8 + $0x50] sm:$0xff] }
 0x2aa   : > { %1486 = vmatpush.msrb.mxu3 %v1463_v34  ;;  %v1603_v34 = vld [vmem:[%s2722_s12] sm:$0x1] }
 0x2ab   : > { %1607 = vmatpush.msra.mxu1 %v1599_v59 }
 0x2ac   : > { %1487 = vmatpush.msrb.mxu3 %v1462_v35 }
 0x2ad   : > { %1608 = vmatpush.msra.mxu1 %v1598_v60 }
 0x2ae   : > { %1544 = vmatpush.msra.mxu3 %v1880_v36 }
 0x2af   : > { %1609 = vmatpush.msra.mxu1 %v1597_v61 }
 0x2b0   : > { %1545 = vmatpush.msra.mxu3 %v1879_v37 }
 0x2b2   : > { %1546 = vmatpush.msra.mxu3 %v1878_v38  ;;  %v1641_v38 = vld [vmem:[%s2757_s11] sm:$0x1] }
 0x2b4   : > { %1547 = vmatpush.msra.mxu3 %v1877_v42 }
 0x2b6   : > { %1548 = vmatpush.msra.mxu3 %v1876_v44 }
 0x2b8   : > { %1549 = vmatpush.msra.mxu3 %v1875_v45 }
 0x313   : > { %v1268_v63 = vpop.f32.mrf.mxu1 }
 0x31f   : > { %v1375_v6 = vpop.f32.mrf.mxu1 }
 0x324   : > { %v1246_v62 = vpop.f32.mrf.mxu3  ;;  %v1303_v1 = vpop.f32.mrf.mxu2 }
 0x325   : > { %v1269_v0 = vadd.f32 %v1268_v63, %v1246_v62  ;;  %v1596_v62 = vld [vmem:[#allocation8 + $0x48] sm:$0xff]  ;;  %v1595_v63 = vld [vmem:[#allocation8 + $0x40] sm:$0xff] }
 0x326   : > { %1610 = vmatpush.msra.mxu1 %v1596_v62 }
 0x327   : > { %v1306_v2 = vadd.f32 %v1303_v1, %v1269_v0  ;;  %v1594_v0 = vld [vmem:[#allocation8 + $0x38] sm:$0xff]  ;;  %v1593_v1 = vld [vmem:[#allocation8 + $0x30] sm:$0xff] }
 0x328   : > { %1611 = vmatpush.msra.mxu1 %v1595_v63 }
 0x32a   : > { %1612 = vmatpush.msra.mxu1 %v1594_v0 }
 0x32c   : > { %v1339_v3 = vpop.f32.mrf.mxu3  ;;  %1613 = vmatpush.msra.mxu1 %v1593_v1 }
 0x32d   : > { %v1342_v4 = vadd.f32 %v1339_v3, %v1306_v2  ;;  %v1592_v2 = vld [vmem:[#allocation8 + $0x28] sm:$0xff]  ;;  %v1591_v3 = vld [vmem:[#allocation8 + $0x20] sm:$0xff] }
 0x32e   : > { %1614 = vmatpush.msra.mxu1 %v1592_v2 }
 0x32f   : > { %v1378_v7 = vadd.f32 %v1375_v6, %v1342_v4  ;;  %v1590_v4 = vld [vmem:[#allocation8 + $0x18] sm:$0xff]  ;;  %v1588_v6 = vld [vmem:[#allocation8 + $0x8] sm:$0xff] }
 0x330   : > { %1615 = vmatpush.msra.mxu1 %v1591_v3 }
 0x331   : > { %v1383_v8 = vadd.f32 %v1991_v5, %v1378_v7  ;;  %v1589_v5 = vld [vmem:[#allocation8 + $0x10] sm:$0xff]  ;;  %v1587_v7 = vld [vmem:[#allocation8] sm:$0xff] }
 0x332   : > { %1616 = vmatpush.msra.mxu1 %v1590_v4 }
 0x333   : > { %v1384_v9 = vmax.f32 %v1383_v8, 0.0  ;;  %v1640_v8 = vld [vmem:[#allocation10 + $0x78] sm:$0xff] }
 0x334   : > { %1617 = vmatpush.msra.mxu1 %v1589_v5 }
 0x335   : > { %v1386_v10 = vrot.slane %v1384_v9, 1 }
 0x336   : > { %1618 = vmatpush.msra.mxu1 %v1588_v6 }
 0x337   : > { %v1388_v12 = vmax.f32 %v1384_v9, %v1386_v10  ;;  %v1639_v9 = vld [vmem:[#allocation10 + $0x70] sm:$0xff]  ;;  %v1638_v10 = vld [vmem:[#allocation10 + $0x68] sm:$0xff] }
 0x338   : > { %1619 = vmatpush.msra.mxu1 %v1587_v7 }
 0x339   : > { %1863 = vmatpush.msk.msrb.mxu2 %vm600_vm1, %v1388_v12  ;;  %v1637_v12 = vld [vmem:[#allocation10 + $0x60] sm:$0xff] }
 0x33a   : > { %1864 = vmatmul.msk.f32.vlgmr.msrb.gmra.mxu2 %vm1390_vm9, %v1389_v13  ;;  %v1636_v13 = vld [vmem:[#allocation10 + $0x58] sm:$0xff] }
 0x33b   : > { %1642 = vmatpush.msra.mxu2 %v1640_v8 }
 0x33d   : > { %1643 = vmatpush.msra.mxu2 %v1639_v9 }
 0x33f   : > { %1644 = vmatpush.msra.mxu2 %v1638_v10 }
 0x341   : > { %1645 = vmatpush.msra.mxu2 %v1637_v12 }
 0x343   : > { %1646 = vmatpush.msra.mxu2 %v1636_v13 }
 0x345   : > { %1647 = vmatpush.msra.mxu2 %v1635_v11 }
 0x347   : > { %1648 = vmatpush.msra.mxu2 %v1634_v15 }
 0x349   : > { %1649 = vmatpush.msra.mxu2 %v1633_v17 }
 0x34b   : > { %1650 = vmatpush.msra.mxu2 %v1632_v18 }
 0x34d   : > { %1651 = vmatpush.msra.mxu2 %v1631_v19 }
 0x34f   : > { %1652 = vmatpush.msra.mxu2 %v1630_v21 }
 0x351   : > { %1653 = vmatpush.msra.mxu2 %v1629_v24 }
 0x3bd   : > { %v1414_v25 = vpop.f32.mrf.mxu2 }
 0x3be   : > { %1418 = vrot.lane.b32.xlu2 %v1414_v25, %s2231_s24  ;;  %s1688_s24 = sshll.u32 %s1684_s30, 4  ;;  %s1689_s24 = int_to_ptr.hbm [resolvable:$true] %s1688_s24 }
 0x3bf   : > { %s2160_s23 = sshra.s32 %s1689_s24, 4  ;;  %s2161_s23 = int_to_ptr.hbm [resolvable:$true] %s2160_s23 }
 0x3c0   : > { %s2162_s26 = scalar_lea.hbm %s2161_s23, 1  ;;  %p2167_p3 = scmp.lt.s32.totalorder %s2161_s23, %s2759_s28 }
 0x3c1   : > { %p2163_p0 = scmp.ne.s32.totalorder %s2161_s23, %s2162_s26  ;;  %p2168_p4 = scmp.lt.s32.totalorder %s2166_s22, %s2162_s26 }
 0x3c3   : > { %p2164_p1 = pnand %p2163_p0, %p2350_p5  ;;  %p2169_p7 = por %p2168_p4, %p2167_p3 }
 0x3c5   : > { %p2165_p2 = pneg %p2164_p1 }
 0x3c7   : > { %p2170_p8 = pnand %p2169_p7, %p2165_p2 }
 0x418   : > { %v1419_v39 = vpop.permute.xlu2 %1418 }
 0x419   : > { %v1421_v40 = vmax.f32 %v1414_v25, %v1419_v39  ;;  %v1628_v25 = vld [vmem:[#allocation10 + $0x18] sm:$0xff] }
 0x41a   : > { %1654 = vmatpush.msra.mxu2 %v1628_v25 }
 0x41b   : > { %1866 = vmatmul.msk.f32.vlgmr.msrb.gmra.mxu0 %vm1434_vm10, %v1421_v40 }
 0x41c   : > { %1655 = vmatpush.msra.mxu2 %v1627_v31 }
 0x41e   : > { %1656 = vmatpush.msra.mxu2 %v1626_v32 }
 0x420   : > { %1657 = vmatpush.msra.mxu2 %v1625_v33 }
 0x498   : > { %v1458_v50 = vpop.f32.mrf.mxu0 }
 0x499   : > { %v1500_v51 = vrot.slane %v1458_v50, 1  ;;  %1867 = vmatmul.msk.f32.vlgmr.msrb.gmra.mxu3 %vm1468_vm11, %v1458_v50  ;;  %v1531_v55 = vrot.slane %v1458_v50, 2  ;;  %v1562_v58 = vrot.slane %v1458_v50, 3 }
 0x49a   : > { %1575 = vmatpush.msrb.mxu3 %v1887_v49 }
 0x49b   : > { %1874 = vmatmul.msk.f32.vlgmr.msrb.gmra.mxu1 %vm1468_vm11, %v1500_v51 }
 0x49c   : > { %1576 = vmatpush.msrb.mxu3 %v1886_v52 }
 0x49e   : > { %1577 = vmatpush.msrb.mxu3 %v1885_v53 }
 0x4a0   : > { %1578 = vmatpush.msrb.mxu3 %v1884_v54 }
 0x4a1   : > { %1881 = vmatmul.msk.f32.vlgmr.msra.gmra.mxu3 %vm1468_vm11, %v1531_v55 }
 0x4a2   : > { %1579 = vmatpush.msrb.mxu3 %v1883_v56 }
 0x4a4   : > { %1580 = vmatpush.msrb.mxu3 %v1882_v57 }
 0x4a9   : > { %1888 = vmatmul.msk.f32.vlgmr.msrb.gmra.mxu3 %vm1468_vm11, %v1562_v58 }
 0x518   : > { %v1520_v26 = vpop.f32.mrf.mxu1 }
 0x51c   : > { %v1489_v16 = vpop.f32.mrf.mxu3 }
 0x51d   : > { %v1492_v23 = vadd.f32 %v1489_v16, %v1461_v20 }
 0x51f   : > { %v1523_v27 = vadd.f32 %v1520_v26, %v1492_v23 }
 0x524   : > { %v1551_v22 = vpop.f32.mrf.mxu3 }
 0x525   : > { %v1554_v28 = vadd.f32 %v1551_v22, %v1523_v27 }
 0x52c   : > { %v1582_v14 = vpop.f32.mrf.mxu3 }
 0x52d   : > { %v1585_v29 = vadd.f32 %v1582_v14, %v1554_v28 }
 0x52f   : > { %v1586_v30 = vmax.f32 %v1585_v29, 0.0 }
 0x531   : > { %1620 = vmatmul.f32.vlgmr.msra.gmra.mxu1 %v1586_v30 }
 0x5ae   : > { %v1621_v35 = vpop.f32.mrf.mxu1 }
 0x5af   : > { %v1622_v36 = vadd.f32 %v1621_v35, %v1603_v34 }
 0x5b1   : > { %v1624_v37 = vmax.f32 %v1622_v36, 0.0 }
 0x5b3   : > { %1658 = vmatmul.f32.vlgmr.msra.gmra.mxu2 %v1624_v37 }
 0x636   : > { %v1659_v39 = vpop.f32.mrf.mxu2 }
 0x637   : > { %v1660_v40 = vadd.f32 %v1659_v39, %v1641_v38 }
 0x639   : > { %v1663_v41 = vsel %vm1662_vm12, %v1660_v40, -inf }
 0x63a   : > { %1664 = vmax.xlane.f32.xlu2 %v1663_v41 }
 0x6ad   : > { %v1665_v42 = vpop.xlane.xlu2 %1664 }
 0x6ae   : > { %v1666_v43 = vsub.f32 %v1660_v40, %v1665_v42 }
 0x6b0   : > { %v1667_v44 = vmul.f32 1.442695, %v1666_v43 }
 0x6b2   : > { %1992 = vpow2.f32 %v1667_v44 }
 0x6b8   : > { %v1993_v45 = vpop.eup %1992 }
 0x6b9   : > { %v1669_v46 = vsel %vm1662_vm12, %v1993_v45, 0.0 }
 0x6ba   : > { %1670 = vadd.xlane.f32.xlu0 %v1669_v46 }
 0x72d   : > { %v1671_v47 = vpop.xlane.xlu0 %1670 }
 0x72e   : > { %1994 = vrcp.f32 %v1671_v47 }
 0x734   : > { %v1995_v48 = vpop.eup %1994 }
 0x735   : > { %v1673_v49 = vmul.f32 %v1995_v48, %v1993_v45 }
 0x737   : > { %1674 = vst [vmem:[%s569_s16] sm:$0x1] %v1673_v49 }
 0x738   : > { %2173 = shalt.err (!%p2170_p8)
}
 0x739   : > { %1916 = dma.vmem_to_hbm [thread:$0]  (%p2350_p5), %s1687_s17, 16, %s1689_s24, %s1676_s20  }
 0x73a PF: > { %s2760_s25 = sld [smem:[#allocation19_spill]] }
 0x73b   : > { %s2761_s1 = sld [smem:[#allocation16_spill]] }
 0x740   : > { %p1948_p9 = scmp.ge.s32.totalorder %s2760_s25, 2 }
 0x741   : > { %s1700_s14 = sand.u32 1, %s2761_s1  }
 0x742   : > { %p1935_p10 = pnand %p1948_p9, %p2354_p6  ;;  %s1701_s19 = scalar_lea.sflag [#allocation4], %s1700_s14 }
 0x744   : > { %p1936_p11 = pneg %p1935_p10 }
 0x746   : > { %2203 = dma.done.wait (%p1936_p11), %s1701_s19, 16  }
 0x747   : > { %2205 = vsyncadd (%p1936_p11), %s1701_s19, 4294967280  ;;  %s2763_s21 = sld [smem:[#allocation20_spill]] }
 0x748   : > { %s2764_s18 = sld [smem:[#allocation17_spill]] }
 0x749   : > { %s2765_s19 = sld [smem:[#allocation18_spill]] }
 0x74a   : > { %s2766_s20 = sld [smem:[#allocation21_spill]] }
 0x74d   : > { %p28_p12 = scmp.ge.s32.totalorder %s2763_s21, 4  }
 0x74f   :  { %30 = sbr.rel (!%p28_p12) target bundleno = 12 (0xc), region = 147 }
 0x754   :  { %1706 = vsyncpa [#allocation3], 1 }
 0x755   :  { %1708 = vsyncpa [#allocation3 + $0x1], 1 }
 0x756   :  { %1709 = vsyncpa [#allocation6], 1 }
 0x757   :  { %1710 = vsyncpa [#allocation9], 1 }
 0x758   :  { %1711 = vsyncpa [#allocation4], 1 }
 0x759   :  { %1713 = vsyncpa [#allocation4 + $0x1], 1 }

</bundles_post_ra>
